<compile_context>
chip_gen: v5e
topology: v5e:2x2
jax: 0.10.0
libtpu: 0.0.40
codegen_flags: <defaults>
</compile_context>

<pallas_src>
import jax
import jax.numpy as jnp
import numpy as np
from jax.experimental import pallas as pl
from jax.experimental.pallas import tpu as pltpu


HIDDEN = 256


def _critic_kernel(ss_ref, win_ref, wh_ref, wout_ref, bh_ref, bo_ref, q_ref):
    # MXU inputs in bf16; accumulation f32 (preferred_element_type); bias add
    # and ReLU stay f32 (v5e has no bf16 VPU path), then cast eagerly to bf16.
    ss = ss_ref[...].astype(jnp.bfloat16)

    def relu_bf16(acc_f32, bias_f32):
        return jnp.maximum(acc_f32 + bias_f32, 0.0).astype(jnp.bfloat16)

    # Layer 1 of both towers (two independent dependency chains).
    h1 = relu_bf16(
        jnp.dot(ss, win_ref[0], preferred_element_type=jnp.float32),
        bh_ref[:, 0 * HIDDEN:1 * HIDDEN])
    h2 = relu_bf16(
        jnp.dot(ss, win_ref[1], preferred_element_type=jnp.float32),
        bh_ref[:, 4 * HIDDEN:5 * HIDDEN])

    # Hidden layers 2..4, interleaved between the two towers so back-to-back
    # independent matmuls hide MXU result latency.
    for k in range(3):
        n1 = jnp.dot(h1, wh_ref[k], preferred_element_type=jnp.float32)
        n2 = jnp.dot(h2, wh_ref[3 + k], preferred_element_type=jnp.float32)
        h1 = relu_bf16(n1, bh_ref[:, (1 + k) * HIDDEN:(2 + k) * HIDDEN])
        h2 = relu_bf16(n2, bh_ref[:, (5 + k) * HIDDEN:(6 + k) * HIDDEN])

    # Block-diagonal output head: concat along lanes (256 | 256 -> 512, both
    # multiples of 128 so no relayout), then a single MXU op writes (TB, 2).
    h_cat = jnp.concatenate([h1, h2], axis=1)
    q = jnp.dot(h_cat, wout_ref[...],
                preferred_element_type=jnp.float32) + bo_ref[...]
    q_ref[...] = q.astype(q_ref.dtype)


def pack_critic_params(params, state_dim, action_dim):
    """Pack the 10 (W, b) pairs once (call outside the hot path).

    Weights are stored in bf16 (MXU-native), biases in f32.
      win  : [2, K_pad, 256]   first layer of each tower, rows zero-padded
      wh   : [6, 256, 256]     hidden layers  (l2,l3,l4, l7,l8,l9)
      wout : [512, 2]          block-diagonal heads (l5 top-left, l10 bot-right)
      bh   : [1, 2048]         hidden biases  (l1..l4, l6..l9)
      bo   : [1, 2]            head biases    (l5, l10)
    """
    K = state_dim + action_dim
    K_pad = max(32, int(np.ceil(K / 32) * 32))
    w = {n: params[n][0] for n in params}
    b = {n: params[n][1] for n in params}
    bf = jnp.bfloat16

    def pad_k(wk):  # [K, 256] -> [K_pad, 256]
        return jnp.pad(wk, ((0, K_pad - K), (0, 0)))

    win = jnp.stack([pad_k(w["l1"]), pad_k(w["l6"])]).astype(bf)
    wh = jnp.stack([w["l2"], w["l3"], w["l4"],
                    w["l7"], w["l8"], w["l9"]]).astype(bf)
    wout = jnp.zeros((2 * HIDDEN, 2), jnp.float32)
    wout = wout.at[:HIDDEN, 0:1].set(w["l5"])
    wout = wout.at[HIDDEN:, 1:2].set(w["l10"])
    wout = wout.astype(bf)
    bh = jnp.concatenate([b["l1"], b["l2"], b["l3"], b["l4"],
                          b["l6"], b["l7"], b["l8"], b["l9"]]
                         ).reshape(1, -1).astype(jnp.float32)
    bo = jnp.concatenate([b["l5"], b["l10"]]).reshape(1, 2).astype(jnp.float32)
    return {"win": win, "wh": wh, "wout": wout, "bh": bh, "bo": bo,
            "K": K, "K_pad": K_pad}


def _choose_tiling(B):
    """Pick the batch tile. Small batches: one tile. Large batches: >= 2 tiles
    (cap 1024 rows) so the 'parallel' batch axis shards across v7x's 2 TCs."""
    B8 = int(np.ceil(max(B, 1) / 8) * 8)
    if B8 < 256:
        TB = B8
    else:
        TB = min(1024, int(np.ceil(B8 / 2 / 8)) * 8)
    B_pad = int(np.ceil(B8 / TB) * TB)
    return TB, B_pad


def critic_forward(state, action, packed):
    """state: [B, state_dim], action: [B, action_dim] -> (q1 [B,1], q2 [B,1]).

    `packed` is the output of pack_critic_params (repack only after optimizer
    updates, not every forward)."""
    B = state.shape[0]
    K, K_pad = packed["K"], packed["K_pad"]
    win, wh, wout, bh, bo = (packed["win"], packed["wh"], packed["wout"],
                             packed["bh"], packed["bo"])

    TB, B_pad = _choose_tiling(B)

    # Wrapper-side concat + pad: one (B_pad, K_pad) f32 slab feeds both towers.
    ss = jnp.concatenate([state, action], axis=1)
    ss = jnp.pad(ss, ((0, B_pad - B), (0, K_pad - K)))

    def const_spec(shape):
        return pl.BlockSpec(shape, lambda i, _n=len(shape): (0,) * _n)

    weight_bytes = (win.size + wh.size + wout.size) * 2 + (bh.size + bo.size) * 4
    cost = pl.CostEstimate(
        flops=2 * B_pad * (2 * K_pad * HIDDEN + 6 * HIDDEN * HIDDEN
                           + 2 * HIDDEN * 2),
        transcendentals=0,
        bytes_accessed=B_pad * K_pad * 4 + weight_bytes + B_pad * 2 * 4,
    )

    q = pl.pallas_call(
        _critic_kernel,
        out_shape=jax.ShapeDtypeStruct((B_pad, 2), jnp.float32),
        grid_spec=pltpu.PrefetchScalarGridSpec(
            num_scalar_prefetch=0,
            grid=(B_pad // TB,),
            in_specs=[
                pl.BlockSpec((TB, K_pad), lambda i: (i, 0)),
                const_spec(win.shape),
                const_spec(wh.shape),
                const_spec(wout.shape),
                const_spec(bh.shape),
                const_spec(bo.shape),
            ],
            out_specs=pl.BlockSpec((TB, 2), lambda i: (i, 0)),
        ),
        compiler_params=pltpu.CompilerParams(
            dimension_semantics=("parallel",)),
        cost_estimate=cost,
    )(ss, win, wh, wout, bh, bo)

    return q[:B, 0:1], q[:B, 1:2]


def init_critic_params(key, state_dim, action_dim):
    """PyTorch-Linear-style init (uniform +-1/sqrt(fan_in)); weights stored
    pre-transposed as [in_features, out_features] in f32."""
    dims = [
        (state_dim + action_dim, HIDDEN),  # l1
        (HIDDEN, HIDDEN),                  # l2
        (HIDDEN, HIDDEN),                  # l3
        (HIDDEN, HIDDEN),                  # l4
        (HIDDEN, 1),                       # l5
        (state_dim + action_dim, HIDDEN),  # l6
        (HIDDEN, HIDDEN),                  # l7
        (HIDDEN, HIDDEN),                  # l8
        (HIDDEN, HIDDEN),                  # l9
        (HIDDEN, 1),                       # l10
    ]
    names = ["l1", "l2", "l3", "l4", "l5", "l6", "l7", "l8", "l9", "l10"]
    params = {}
    for name, (fan_in, fan_out) in zip(names, dims):
        key, kw, kb = jax.random.split(key, 3)
        bound = 1.0 / np.sqrt(fan_in)
        w = jax.random.uniform(kw, (fan_in, fan_out), jnp.float32, -bound, bound)
        b = jax.random.uniform(kb, (fan_out,), jnp.float32, -bound, bound)
        params[name] = (w, b)
    return params


def _reference_forward_f32(state, action, params):
    ss = jnp.concatenate([state, action], axis=1)

    def tower(names):
        h = ss
        for n in names[:4]:
            w, b = params[n]
            h = jnp.maximum(h @ w + b, 0.0)
        w, b = params[names[4]]
        return h @ w + b

    return (tower(["l1", "l2", "l3", "l4", "l5"]),
            tower(["l6", "l7", "l8", "l9", "l10"]))


def _reference_forward_mixed(state, action, params):
    """Mimics kernel precision: bf16 weights & matmul inputs, f32 accumulate,
    f32 bias+ReLU, bf16 re-cast of hidden activations."""
    bf = jnp.bfloat16
    ss = jnp.concatenate([state, action], axis=1).astype(bf)

    def tower(names):
        h = ss
        for n in names[:4]:
            w, b = params[n]
            h = jnp.maximum(
                jnp.dot(h, w.astype(bf), preferred_element_type=jnp.float32) + b,
                0.0).astype(bf)
        w, b = params[names[4]]
        return jnp.dot(h, w.astype(bf), preferred_element_type=jnp.float32) + b

    return (tower(["l1", "l2", "l3", "l4", "l5"]),
            tower(["l6", "l7", "l8", "l9", "l10"]))


if __name__ == "__main__":
    state_dim, action_dim, batch = 17, 6, 8

    key = jax.random.PRNGKey(0)
    kp, ks, ka = jax.random.split(key, 3)
    params = init_critic_params(kp, state_dim, action_dim)
    state = jax.random.normal(ks, (batch, state_dim), jnp.float32)
    action = jax.random.normal(ka, (batch, action_dim), jnp.float32)

    # Pack ONCE (outside the hot path), then run the kernel.
    packed = pack_critic_params(params, state_dim, action_dim)
    q1, q2 = critic_forward(state, action, packed)
    q1 = jax.block_until_ready(q1)
    q2 = jax.block_until_ready(q2)
    assert q1.shape == (batch, 1) and q2.shape == (batch, 1)

    # Tight check against a precision-matched (bf16-weight) reference.
    m1, m2 = _reference_forward_mixed(state, action, params)
    np.testing.assert_allclose(np.asarray(q1), np.asarray(m1), rtol=1e-2, atol=1e-3)
    np.testing.assert_allclose(np.asarray(q2), np.asarray(m2), rtol=1e-2, atol=1e-3)

    # Loose check against the pure-f32 PyTorch-equivalent reference
    # (tolerance widened because weights are stored in bf16).
    r1, r2 = _reference_forward_f32(state, action, params)
    np.testing.assert_allclose(np.asarray(q1), np.asarray(r1), rtol=5e-2, atol=5e-2)
    np.testing.assert_allclose(np.asarray(q2), np.asarray(r2), rtol=5e-2, atol=5e-2)

    # Also exercise a >=256 batch so the 2-tile (megacore) path is compiled/run.
    ks2, ka2 = jax.random.split(jax.random.PRNGKey(1))
    state_b = jax.random.normal(ks2, (300, state_dim), jnp.float32)
    action_b = jax.random.normal(ka2, (300, action_dim), jnp.float32)
    qb1, qb2 = critic_forward(state_b, action_b, packed)
    jax.block_until_ready((qb1, qb2))
    mb1, mb2 = _reference_forward_mixed(state_b, action_b, params)
    np.testing.assert_allclose(np.asarray(qb1), np.asarray(mb1), rtol=1e-2, atol=1e-3)
    np.testing.assert_allclose(np.asarray(qb2), np.asarray(mb2), rtol=1e-2, atol=1e-3)

    print("KERNEL_OK")
</pallas_src>

<mosaic_0001>
module attributes {stable_mosaic.version = 11 : i64} {
  func.func @_critic_kernel(%arg0: i32, %arg1: memref<8x32xf32, #tpu.memory_space<vmem>>, %arg2: memref<2x32x256xbf16, #tpu.memory_space<vmem>>, %arg3: memref<6x256x256xbf16, #tpu.memory_space<vmem>>, %arg4: memref<512x2xbf16, #tpu.memory_space<vmem>>, %arg5: memref<1x2048xf32, #tpu.memory_space<vmem>>, %arg6: memref<1x2xf32, #tpu.memory_space<vmem>>, %arg7: memref<8x2xf32, #tpu.memory_space<vmem>>) attributes {dimension_semantics = [#tpu.dimension_semantics<parallel>], iteration_bounds = array<i64: 1>, scalar_prefetch = 0 : i64, scratch_operands = 0 : i64, tpu.core_type = #tpu.core_type<tc>, window_params = [{transform_indices = @transform_0, window_bounds = array<i64: 8, 32>}, {pipeline_mode = #tpu.pipeline_mode<synchronous>, transform_indices = @transform_1, window_bounds = array<i64: 2, 32, 256>}, {pipeline_mode = #tpu.pipeline_mode<synchronous>, transform_indices = @transform_2, window_bounds = array<i64: 6, 256, 256>}, {pipeline_mode = #tpu.pipeline_mode<synchronous>, transform_indices = @transform_3, window_bounds = array<i64: 512, 2>}, {pipeline_mode = #tpu.pipeline_mode<synchronous>, transform_indices = @transform_4, window_bounds = array<i64: 1, 2048>}, {pipeline_mode = #tpu.pipeline_mode<synchronous>, transform_indices = @transform_5, window_bounds = array<i64: 1, 2>}, {transform_indices = @transform_6, window_bounds = array<i64: 8, 2>}]} {
    %c0 = arith.constant 0 : index
    %c0_0 = arith.constant 0 : index
    %0 = vector.load %arg1[%c0, %c0_0] : memref<8x32xf32, #tpu.memory_space<vmem>>, vector<8x32xf32>
    %1 = arith.truncf %0 : vector<8x32xf32> to vector<8x32xbf16>
    %c0_1 = arith.constant 0 : index
    %c0_2 = arith.constant 0 : index
    %c0_3 = arith.constant 0 : index
    %2 = vector.load %arg2[%c0_1, %c0_2, %c0_3] : memref<2x32x256xbf16, #tpu.memory_space<vmem>>, vector<1x32x256xbf16>
    %3 = vector.shape_cast %2 : vector<1x32x256xbf16> to vector<32x256xbf16>
    %cst = arith.constant dense<0.000000e+00> : vector<8x256xf32>
    %4 = tpu.matmul %1, %3, %cst {dimension_numbers = #tpu.dot_dimension_numbers<[1], [0], [0], [1], [0, 0, 1, 1], [], []>} : vector<8x32xbf16>, vector<32x256xbf16>, vector<8x256xf32> -> vector<8x256xf32>
    %c0_4 = arith.constant 0 : index
    %c0_5 = arith.constant 0 : index
    %5 = vector.load %arg5[%c0_4, %c0_5] : memref<1x2048xf32, #tpu.memory_space<vmem>>, vector<1x256xf32>
    %6 = vector.broadcast %5 : vector<1x256xf32> to vector<8x256xf32>
    %7 = arith.addf %4, %6 : vector<8x256xf32>
    %cst_6 = arith.constant 0.000000e+00 : f32
    %8 = vector.broadcast %cst_6 : f32 to vector<8x256xf32>
    %9 = arith.maximumf %7, %8 : vector<8x256xf32>
    %10 = arith.truncf %9 : vector<8x256xf32> to vector<8x256xbf16>
    %c1 = arith.constant 1 : index
    %c0_7 = arith.constant 0 : index
    %c0_8 = arith.constant 0 : index
    %11 = vector.load %arg2[%c1, %c0_7, %c0_8] : memref<2x32x256xbf16, #tpu.memory_space<vmem>>, vector<1x32x256xbf16>
    %12 = vector.shape_cast %11 : vector<1x32x256xbf16> to vector<32x256xbf16>
    %cst_9 = arith.constant dense<0.000000e+00> : vector<8x256xf32>
    %13 = tpu.matmul %1, %12, %cst_9 {dimension_numbers = #tpu.dot_dimension_numbers<[1], [0], [0], [1], [0, 0, 1, 1], [], []>} : vector<8x32xbf16>, vector<32x256xbf16>, vector<8x256xf32> -> vector<8x256xf32>
    %c0_10 = arith.constant 0 : index
    %c1024 = arith.constant 1024 : index
    %14 = vector.load %arg5[%c0_10, %c1024] : memref<1x2048xf32, #tpu.memory_space<vmem>>, vector<1x256xf32>
    %15 = vector.broadcast %14 : vector<1x256xf32> to vector<8x256xf32>
    %16 = arith.addf %13, %15 : vector<8x256xf32>
    %cst_11 = arith.constant 0.000000e+00 : f32
    %17 = vector.broadcast %cst_11 : f32 to vector<8x256xf32>
    %18 = arith.maximumf %16, %17 : vector<8x256xf32>
    %19 = arith.truncf %18 : vector<8x256xf32> to vector<8x256xbf16>
    %c0_12 = arith.constant 0 : index
    %c0_13 = arith.constant 0 : index
    %c0_14 = arith.constant 0 : index
    %20 = vector.load %arg3[%c0_12, %c0_13, %c0_14] : memref<6x256x256xbf16, #tpu.memory_space<vmem>>, vector<1x256x256xbf16>
    %21 = vector.shape_cast %20 : vector<1x256x256xbf16> to vector<256x256xbf16>
    %cst_15 = arith.constant dense<0.000000e+00> : vector<8x256xf32>
    %22 = tpu.matmul %10, %21, %cst_15 {dimension_numbers = #tpu.dot_dimension_numbers<[1], [0], [0], [1], [0, 0, 1, 1], [], []>} : vector<8x256xbf16>, vector<256x256xbf16>, vector<8x256xf32> -> vector<8x256xf32>
    %c3 = arith.constant 3 : index
    %c0_16 = arith.constant 0 : index
    %c0_17 = arith.constant 0 : index
    %23 = vector.load %arg3[%c3, %c0_16, %c0_17] : memref<6x256x256xbf16, #tpu.memory_space<vmem>>, vector<1x256x256xbf16>
    %24 = vector.shape_cast %23 : vector<1x256x256xbf16> to vector<256x256xbf16>
    %cst_18 = arith.constant dense<0.000000e+00> : vector<8x256xf32>
    %25 = tpu.matmul %19, %24, %cst_18 {dimension_numbers = #tpu.dot_dimension_numbers<[1], [0], [0], [1], [0, 0, 1, 1], [], []>} : vector<8x256xbf16>, vector<256x256xbf16>, vector<8x256xf32> -> vector<8x256xf32>
    %c0_19 = arith.constant 0 : index
    %c256 = arith.constant 256 : index
    %26 = vector.load %arg5[%c0_19, %c256] : memref<1x2048xf32, #tpu.memory_space<vmem>>, vector<1x256xf32>
    %27 = vector.broadcast %26 : vector<1x256xf32> to vector<8x256xf32>
    %28 = arith.addf %22, %27 : vector<8x256xf32>
    %cst_20 = arith.constant 0.000000e+00 : f32
    %29 = vector.broadcast %cst_20 : f32 to vector<8x256xf32>
    %30 = arith.maximumf %28, %29 : vector<8x256xf32>
    %31 = arith.truncf %30 : vector<8x256xf32> to vector<8x256xbf16>
    %c0_21 = arith.constant 0 : index
    %c1280 = arith.constant 1280 : index
    %32 = vector.load %arg5[%c0_21, %c1280] : memref<1x2048xf32, #tpu.memory_space<vmem>>, vector<1x256xf32>
    %33 = vector.broadcast %32 : vector<1x256xf32> to vector<8x256xf32>
    %34 = arith.addf %25, %33 : vector<8x256xf32>
    %cst_22 = arith.constant 0.000000e+00 : f32
    %35 = vector.broadcast %cst_22 : f32 to vector<8x256xf32>
    %36 = arith.maximumf %34, %35 : vector<8x256xf32>
    %37 = arith.truncf %36 : vector<8x256xf32> to vector<8x256xbf16>
    %c1_23 = arith.constant 1 : index
    %c0_24 = arith.constant 0 : index
    %c0_25 = arith.constant 0 : index
    %38 = vector.load %arg3[%c1_23, %c0_24, %c0_25] : memref<6x256x256xbf16, #tpu.memory_space<vmem>>, vector<1x256x256xbf16>
    %39 = vector.shape_cast %38 : vector<1x256x256xbf16> to vector<256x256xbf16>
    %cst_26 = arith.constant dense<0.000000e+00> : vector<8x256xf32>
    %40 = tpu.matmul %31, %39, %cst_26 {dimension_numbers = #tpu.dot_dimension_numbers<[1], [0], [0], [1], [0, 0, 1, 1], [], []>} : vector<8x256xbf16>, vector<256x256xbf16>, vector<8x256xf32> -> vector<8x256xf32>
    %c4 = arith.constant 4 : index
    %c0_27 = arith.constant 0 : index
    %c0_28 = arith.constant 0 : index
    %41 = vector.load %arg3[%c4, %c0_27, %c0_28] : memref<6x256x256xbf16, #tpu.memory_space<vmem>>, vector<1x256x256xbf16>
    %42 = vector.shape_cast %41 : vector<1x256x256xbf16> to vector<256x256xbf16>
    %cst_29 = arith.constant dense<0.000000e+00> : vector<8x256xf32>
    %43 = tpu.matmul %37, %42, %cst_29 {dimension_numbers = #tpu.dot_dimension_numbers<[1], [0], [0], [1], [0, 0, 1, 1], [], []>} : vector<8x256xbf16>, vector<256x256xbf16>, vector<8x256xf32> -> vector<8x256xf32>
    %c0_30 = arith.constant 0 : index
    %c512 = arith.constant 512 : index
    %44 = vector.load %arg5[%c0_30, %c512] : memref<1x2048xf32, #tpu.memory_space<vmem>>, vector<1x256xf32>
    %45 = vector.broadcast %44 : vector<1x256xf32> to vector<8x256xf32>
    %46 = arith.addf %40, %45 : vector<8x256xf32>
    %cst_31 = arith.constant 0.000000e+00 : f32
    %47 = vector.broadcast %cst_31 : f32 to vector<8x256xf32>
    %48 = arith.maximumf %46, %47 : vector<8x256xf32>
    %49 = arith.truncf %48 : vector<8x256xf32> to vector<8x256xbf16>
    %c0_32 = arith.constant 0 : index
    %c1536 = arith.constant 1536 : index
    %50 = vector.load %arg5[%c0_32, %c1536] : memref<1x2048xf32, #tpu.memory_space<vmem>>, vector<1x256xf32>
    %51 = vector.broadcast %50 : vector<1x256xf32> to vector<8x256xf32>
    %52 = arith.addf %43, %51 : vector<8x256xf32>
    %cst_33 = arith.constant 0.000000e+00 : f32
    %53 = vector.broadcast %cst_33 : f32 to vector<8x256xf32>
    %54 = arith.maximumf %52, %53 : vector<8x256xf32>
    %55 = arith.truncf %54 : vector<8x256xf32> to vector<8x256xbf16>
    %c2 = arith.constant 2 : index
    %c0_34 = arith.constant 0 : index
    %c0_35 = arith.constant 0 : index
    %56 = vector.load %arg3[%c2, %c0_34, %c0_35] : memref<6x256x256xbf16, #tpu.memory_space<vmem>>, vector<1x256x256xbf16>
    %57 = vector.shape_cast %56 : vector<1x256x256xbf16> to vector<256x256xbf16>
    %cst_36 = arith.constant dense<0.000000e+00> : vector<8x256xf32>
    %58 = tpu.matmul %49, %57, %cst_36 {dimension_numbers = #tpu.dot_dimension_numbers<[1], [0], [0], [1], [0, 0, 1, 1], [], []>} : vector<8x256xbf16>, vector<256x256xbf16>, vector<8x256xf32> -> vector<8x256xf32>
    %c5 = arith.constant 5 : index
    %c0_37 = arith.constant 0 : index
    %c0_38 = arith.constant 0 : index
    %59 = vector.load %arg3[%c5, %c0_37, %c0_38] : memref<6x256x256xbf16, #tpu.memory_space<vmem>>, vector<1x256x256xbf16>
    %60 = vector.shape_cast %59 : vector<1x256x256xbf16> to vector<256x256xbf16>
    %cst_39 = arith.constant dense<0.000000e+00> : vector<8x256xf32>
    %61 = tpu.matmul %55, %60, %cst_39 {dimension_numbers = #tpu.dot_dimension_numbers<[1], [0], [0], [1], [0, 0, 1, 1], [], []>} : vector<8x256xbf16>, vector<256x256xbf16>, vector<8x256xf32> -> vector<8x256xf32>
    %c0_40 = arith.constant 0 : index
    %c768 = arith.constant 768 : index
    %62 = vector.load %arg5[%c0_40, %c768] : memref<1x2048xf32, #tpu.memory_space<vmem>>, vector<1x256xf32>
    %63 = vector.broadcast %62 : vector<1x256xf32> to vector<8x256xf32>
    %64 = arith.addf %58, %63 : vector<8x256xf32>
    %cst_41 = arith.constant 0.000000e+00 : f32
    %65 = vector.broadcast %cst_41 : f32 to vector<8x256xf32>
    %66 = arith.maximumf %64, %65 : vector<8x256xf32>
    %67 = arith.truncf %66 : vector<8x256xf32> to vector<8x256xbf16>
    %c0_42 = arith.constant 0 : index
    %c1792 = arith.constant 1792 : index
    %68 = vector.load %arg5[%c0_42, %c1792] : memref<1x2048xf32, #tpu.memory_space<vmem>>, vector<1x256xf32>
    %69 = vector.broadcast %68 : vector<1x256xf32> to vector<8x256xf32>
    %70 = arith.addf %61, %69 : vector<8x256xf32>
    %cst_43 = arith.constant 0.000000e+00 : f32
    %71 = vector.broadcast %cst_43 : f32 to vector<8x256xf32>
    %72 = arith.maximumf %70, %71 : vector<8x256xf32>
    %73 = arith.truncf %72 : vector<8x256xf32> to vector<8x256xbf16>
    %74 = tpu.concatenate %67, %73 in 1 : vector<8x256xbf16>, vector<8x256xbf16> -> vector<8x512xbf16>
    %c0_44 = arith.constant 0 : index
    %c0_45 = arith.constant 0 : index
    %75 = vector.load %arg4[%c0_44, %c0_45] : memref<512x2xbf16, #tpu.memory_space<vmem>>, vector<512x2xbf16>
    %cst_46 = arith.constant dense<0.000000e+00> : vector<8x2xf32>
    %76 = tpu.matmul %74, %75, %cst_46 {dimension_numbers = #tpu.dot_dimension_numbers<[1], [0], [0], [1], [0, 0, 1, 1], [], []>} : vector<8x512xbf16>, vector<512x2xbf16>, vector<8x2xf32> -> vector<8x2xf32>
    %c0_47 = arith.constant 0 : index
    %c0_48 = arith.constant 0 : index
    %77 = vector.load %arg6[%c0_47, %c0_48] : memref<1x2xf32, #tpu.memory_space<vmem>>, vector<1x2xf32>
    %78 = vector.broadcast %77 : vector<1x2xf32> to vector<8x2xf32>
    %79 = arith.addf %76, %78 : vector<8x2xf32>
    %c0_49 = arith.constant 0 : index
    %c0_50 = arith.constant 0 : index
    %80 = vector.load %arg7[%c0_49, %c0_50] : memref<8x2xf32, #tpu.memory_space<vmem>>, vector<8x2xf32>
    tpu.vector_store %arg7[%c0_49, %c0_50], %79 {strides = array<i32>} : memref<8x2xf32, #tpu.memory_space<vmem>>, vector<8x2xf32>,
    return
  }
  func.func @transform_0(%arg0: i32) -> (i32, i32) {
    %c0_i32 = arith.constant 0 : i32
    %c0_i32_0 = arith.constant 0 : i32
    return %arg0, %c0_i32 : i32, i32
  }
  func.func @transform_1(%arg0: i32) -> (i32, i32, i32) {
    %c0_i32 = arith.constant 0 : i32
    %c0_i32_0 = arith.constant 0 : i32
    %c0_i32_1 = arith.constant 0 : i32
    %c0_i32_2 = arith.constant 0 : i32
    return %c0_i32, %c0_i32_0, %c0_i32_1 : i32, i32, i32
  }
  func.func @transform_2(%arg0: i32) -> (i32, i32, i32) {
    %c0_i32 = arith.constant 0 : i32
    %c0_i32_0 = arith.constant 0 : i32
    %c0_i32_1 = arith.constant 0 : i32
    %c0_i32_2 = arith.constant 0 : i32
    return %c0_i32, %c0_i32_0, %c0_i32_1 : i32, i32, i32
  }
  func.func @transform_3(%arg0: i32) -> (i32, i32) {
    %c0_i32 = arith.constant 0 : i32
    %c0_i32_0 = arith.constant 0 : i32
    %c0_i32_1 = arith.constant 0 : i32
    return %c0_i32, %c0_i32_0 : i32, i32
  }
  func.func @transform_4(%arg0: i32) -> (i32, i32) {
    %c0_i32 = arith.constant 0 : i32
    %c0_i32_0 = arith.constant 0 : i32
    %c0_i32_1 = arith.constant 0 : i32
    return %c0_i32, %c0_i32_0 : i32, i32
  }
  func.func @transform_5(%arg0: i32) -> (i32, i32) {
    %c0_i32 = arith.constant 0 : i32
    %c0_i32_0 = arith.constant 0 : i32
    %c0_i32_1 = arith.constant 0 : i32
    return %c0_i32, %c0_i32_0 : i32, i32
  }
  func.func @transform_6(%arg0: i32) -> (i32, i32) {
    %c0_i32 = arith.constant 0 : i32
    %c0_i32_0 = arith.constant 0 : i32
    return %arg0, %c0_i32 : i32, i32
  }
}

</mosaic_0001>

<bundles_post_ra>
// kernel: tpu_custom_call.1
= control target key start
LH: loop header
LB: loop body
LE: loop exit
PB: predicated region body
PF: predicated region fallthrough
CT: control target
= control target key end

     0   :  { %11 = vsyncpa [#allocation3], 0  ;;  %s3225_s24 = smov [#allocation2]   ;;  %s3226_s26 = smov 128   ;;  %s3451_s0 = inlined_call_operand.vmem [shape: f32[8,32], index: 0, kind: input, shape index: {}]   ;;  %s3452_s1 = inlined_call_operand.vmem [shape: bf16[2,32,256], index: 1, kind: input, shape index: {}]   ;;  %s3453_s2 = inlined_call_operand.hbm [shape: bf16[6,256,256], index: 2, kind: input, shape index: {}]   ;;  %s3454_s3 = inlined_call_operand.vmem [shape: bf16[512,2], index: 3, kind: input, shape index: {}]   ;;  %s3455_s4 = inlined_call_operand.vmem [shape: f32[1,2048], index: 4, kind: input, shape index: {}]   ;;  %s3456_s5 = inlined_call_operand.vmem [shape: f32[1,2], index: 5, kind: input, shape index: {}]   ;;  %s3457_s6 = inlined_call_operand.vmem [shape: f32[8,2], index: 6, kind: output, shape index: {}]  }
   0x1   :  { %s20_s23 = sshll.u32 %s3453_s2, 4  ;;  %s22_s25 = sshll.u32 %s3225_s24, 4  ;;  %s21_s23 = int_to_ptr.hbm [resolvable:$true] %s20_s23  ;;  %s23_s25 = int_to_ptr.vmem [resolvable:$true] %s22_s25 }
   0x2   :  { %s3227_s27 = smov 8  }
   0x3   :  { %28 = dma.hbm_to_vmem [thread:$0]  %s21_s23, 24576, %s23_s25, [#allocation3], %s3226_s26, %s3226_s26, %s3227_s27  }
   0x4   :  { %3223 = dma.done.wait [#allocation3], 24576  }
   0x5   :  { %3224 = vsyncadd [#allocation3], 4294942720  ;;  %v2037_v0 = vld [vmem:[%s3452_s1 + $0x10] sm:$0xf]  ;;  %v2966_v1 = vld [vmem:[%s3452_s1 + $0x14] sm:$0xf0] }
   0x6   :  { %v2965_v2 = vld [vmem:[%s3452_s1 + $0x14] sm:$0xf]  ;;  %v2038_v3 = vor.u32 %v2966_v1, %v2037_v0  ;;  %v2039_v4 = vld [vmem:[%s3452_s1 + $0x18] sm:$0xf0]  ;;  %v2059_v5 = vld [vmem:[%s3452_s1 + $0x30] sm:$0xf] }
   0x7   :  { %v2970_v6 = vld [vmem:[%s3452_s1 + $0x34] sm:$0xf0]  ;;  %v2042_v7 = vor.u32 %v2965_v2, %v2039_v4  ;;  %v2029_v9 = vld [vmem:[%s3452_s1] sm:$0xf]  ;;  %v2964_v10 = vld [vmem:[%s3452_s1 + $0x4] sm:$0xf0] }
   0x8   :  { %v2060_v8 = vor.u32 %v2970_v6, %v2059_v5  ;;  %v2963_v11 = vld [vmem:[%s3452_s1 + $0x4] sm:$0xf]  ;;  %82 = vmatpush.bf16.msra.mxu0 %v2038_v3  ;;  %v2030_v12 = vor.u32 %v2964_v10, %v2029_v9  ;;  %v2031_v13 = vld [vmem:[%s3452_s1 + $0x8] sm:$0xf0]  ;;  %v2969_v14 = vld [vmem:[%s3452_s1 + $0x34] sm:$0xf] }
   0x9   :  { %v2061_v15 = vld [vmem:[%s3452_s1 + $0x38] sm:$0xf0]  ;;  %95 = vmatpush.bf16.msra.mxu1 %v2042_v7  ;;  %v2034_v16 = vor.u32 %v2963_v11, %v2031_v13  ;;  %v2051_v18 = vld [vmem:[%s3452_s1 + $0x20] sm:$0xf]  ;;  %v2968_v19 = vld [vmem:[%s3452_s1 + $0x24] sm:$0xf0] }
   0xa   :  { %143 = vmatpush.bf16.msra.mxu2 %v2060_v8  ;;  %v2064_v17 = vor.u32 %v2969_v14, %v2061_v15  ;;  %v40_v20 = vld [vmem:[%s3451_s0] sm:$0xff]  ;;  %vm72_vm0 = vcmask 261120   ;;  %v2052_v21 = vor.u32 %v2968_v19, %v2051_v18  ;;  %v2053_v23 = vld [vmem:[%s3452_s1 + $0x28] sm:$0xf0]  ;;  %v2125_v24 = vld [vmem:[#allocation2 + $0x70] sm:$0xf] }
   0xb   :  { %v2967_v22 = vld [vmem:[%s3452_s1 + $0x24] sm:$0xf]  ;;  %v41_v25 = vpack.c.bf16 %v40_v20, %v40_v20  ;;  %v2986_v27 = vld [vmem:[#allocation2 + $0x74] sm:$0xf0]  ;;  %v2189_v28 = vld [vmem:[#allocation2 + $0xf0] sm:$0xf] }
   0xc   :  { %156 = vmatpush.bf16.msra.mxu3 %v2064_v17  ;;  %v2056_v26 = vor.u32 %v2967_v22, %v2053_v23  ;;  %v3002_v29 = vld [vmem:[#allocation2 + $0xf4] sm:$0xf0]  ;;  %83 = vmatpush.bf16.msra.mxu0 %v2030_v12  ;;  %v2126_v30 = vor.u32 %v2986_v27, %v2125_v24  ;;  %v2985_v32 = vld [vmem:[#allocation2 + $0x74] sm:$0xf]  ;;  %v2127_v33 = vld [vmem:[#allocation2 + $0x78] sm:$0xf0] }
   0xd   :  { %v2190_v31 = vor.u32 %v3002_v29, %v2189_v28  ;;  %v3001_v34 = vld [vmem:[#allocation2 + $0xf4] sm:$0xf]  ;;  %96 = vmatpush.bf16.msra.mxu1 %v2034_v16  ;;  %v2130_v35 = vor.u32 %v2985_v32, %v2127_v33  ;;  %v2191_v36 = vld [vmem:[#allocation2 + $0xf8] sm:$0xf0]  ;;  %v2117_v37 = vld [vmem:[#allocation2 + $0x60] sm:$0xf] }
   0xe   :  { %144 = vmatpush.bf16.msra.mxu2 %v2052_v21  ;;  %v2984_v38 = vld [vmem:[#allocation2 + $0x64] sm:$0xf0]  ;;  %v2194_v39 = vor.u32 %v3001_v34, %v2191_v36  ;;  %v2181_v41 = vld [vmem:[#allocation2 + $0xe0] sm:$0xf]  ;;  %v2983_v43 = vld [vmem:[#allocation2 + $0x64] sm:$0xf] }
   0xf   :  { %v2118_v40 = vor.u32 %v2984_v38, %v2117_v37  ;;  %v3000_v42 = vld [vmem:[#allocation2 + $0xe4] sm:$0xf0]  ;;  %2043 = vmatmul.msk.bf16.vlgmr.msra.gmra.mxu0 %vm72_vm0, %v41_v25  ;;  %v2119_v45 = vld [vmem:[#allocation2 + $0x68] sm:$0xf0]  ;;  %v2999_v46 = vld [vmem:[#allocation2 + $0xe4] sm:$0xf] }
  0x10   :  { %398 = vmatpush.bf16.msrb.mxu0 %v2126_v30  ;;  %157 = vmatpush.bf16.msra.mxu3 %v2056_v26  ;;  %v2182_v44 = vor.u32 %v3000_v42, %v2181_v41  ;;  %v2183_v47 = vld [vmem:[#allocation2 + $0xe8] sm:$0xf0]  ;;  %v2109_v48 = vld [vmem:[#allocation2 + $0x50] sm:$0xf]  ;;  %v2982_v49 = vld [vmem:[#allocation2 + $0x54] sm:$0xf0]  ;;  %v2122_v51 = vor.u32 %v2983_v43, %v2119_v45 }
  0x11   :  { %411 = vmatpush.bf16.msrb.mxu1 %v2190_v31  ;;  %2065 = vmatmul.msk.bf16.vlgmr.msra.gmra.mxu2 %vm72_vm0, %v41_v25  ;;  %v2173_v50 = vld [vmem:[#allocation2 + $0xd0] sm:$0xf]  ;;  %v2186_v52 = vor.u32 %v2999_v46, %v2183_v47  ;;  %v2998_v53 = vld [vmem:[#allocation2 + $0xd4] sm:$0xf0]  ;;  %v2981_v54 = vld [vmem:[#allocation2 + $0x54] sm:$0xf]  ;;  %v2110_v55 = vor.u32 %v2982_v49, %v2109_v48 }
  0x12   :  { %2044 = vmatmul.msk.bf16.vlgmr.msra.gmra.mxu1 %vm72_vm0, %v41_v25  ;;  %424 = vmatpush.bf16.msrb.mxu2 %v2130_v35  ;;  %v2111_v56 = vld [vmem:[#allocation2 + $0x58] sm:$0xf0]  ;;  %v2997_v57 = vld [vmem:[#allocation2 + $0xd4] sm:$0xf]  ;;  %v2174_v59 = vor.u32 %v2998_v53, %v2173_v50  ;;  %v2101_v60 = vld [vmem:[#allocation2 + $0x40] sm:$0xf] }
  0x13   :  { %2066 = vmatmul.msk.bf16.vlgmr.msra.gmra.mxu3 %vm72_vm0, %v41_v25  ;;  %v2175_v58 = vld [vmem:[#allocation2 + $0xd8] sm:$0xf0]  ;;  %v2980_v61 = vld [vmem:[#allocation2 + $0x44] sm:$0xf0]  ;;  %v2165_v62 = vld [vmem:[#allocation2 + $0xc0] sm:$0xf]  ;;  %v2114_v0 = vor.u32 %v2981_v54, %v2111_v56 }
  0x14   :  { %437 = vmatpush.bf16.msrb.mxu3 %v2194_v39  ;;  %399 = vmatpush.bf16.msrb.mxu0 %v2118_v40  ;;  %v2996_v63 = vld [vmem:[#allocation2 + $0xc4] sm:$0xf0]  ;;  %v2178_v1 = vor.u32 %v2997_v57, %v2175_v58  ;;  %v2979_v2 = vld [vmem:[#allocation2 + $0x44] sm:$0xf]  ;;  %v2102_v3 = vor.u32 %v2980_v61, %v2101_v60  ;;  %v2103_v4 = vld [vmem:[#allocation2 + $0x48] sm:$0xf0] }
  0x15   :  { %412 = vmatpush.bf16.msrb.mxu1 %v2182_v44  ;;  %v2995_v5 = vld [vmem:[#allocation2 + $0xc4] sm:$0xf]  ;;  %v2167_v6 = vld [vmem:[#allocation2 + $0xc8] sm:$0xf0]  ;;  %v2166_v7 = vor.u32 %v2996_v63, %v2165_v62  ;;  %v2093_v8 = vld [vmem:[#allocation2 + $0x30] sm:$0xf]  ;;  %v2106_v12 = vor.u32 %v2979_v2, %v2103_v4 }
  0x16   :  { %425 = vmatpush.bf16.msrb.mxu2 %v2122_v51  ;;  %v2978_v9 = vld [vmem:[#allocation2 + $0x34] sm:$0xf0]  ;;  %v2157_v10 = vld [vmem:[#allocation2 + $0xb0] sm:$0xf]  ;;  %v2170_v13 = vor.u32 %v2995_v5, %v2167_v6  ;;  %v2977_v14 = vld [vmem:[#allocation2 + $0x34] sm:$0xf] }
  0x17   :  { %v2994_v11 = vld [vmem:[#allocation2 + $0xb4] sm:$0xf0]  ;;  %v2094_v15 = vor.u32 %v2978_v9, %v2093_v8  ;;  %v2095_v16 = vld [vmem:[#allocation2 + $0x38] sm:$0xf0]  ;;  %v2993_v17 = vld [vmem:[#allocation2 + $0xb4] sm:$0xf] }
  0x18   :  { %438 = vmatpush.bf16.msrb.mxu3 %v2186_v52  ;;  %400 = vmatpush.bf16.msrb.mxu0 %v2110_v55  ;;  %v2159_v18 = vld [vmem:[#allocation2 + $0xb8] sm:$0xf0]  ;;  %v2158_v19 = vor.u32 %v2994_v11, %v2157_v10  ;;  %v2085_v20 = vld [vmem:[#allocation2 + $0x20] sm:$0xf]  ;;  %v2976_v21 = vld [vmem:[#allocation2 + $0x24] sm:$0xf0]  ;;  %v2098_v24 = vor.u32 %v2977_v14, %v2095_v16 }
  0x19   :  { %413 = vmatpush.bf16.msrb.mxu1 %v2174_v59  ;;  %v2149_v22 = vld [vmem:[#allocation2 + $0xa0] sm:$0xf]  ;;  %v2992_v23 = vld [vmem:[#allocation2 + $0xa4] sm:$0xf0]  ;;  %v2162_v25 = vor.u32 %v2993_v17, %v2159_v18  ;;  %v2975_v26 = vld [vmem:[#allocation2 + $0x24] sm:$0xf]  ;;  %v2086_v27 = vor.u32 %v2976_v21, %v2085_v20 }
  0x1a   :  { %426 = vmatpush.bf16.msrb.mxu2 %v2114_v0  ;;  %v2087_v28 = vld [vmem:[#allocation2 + $0x28] sm:$0xf0]  ;;  %v2991_v29 = vld [vmem:[#allocation2 + $0xa4] sm:$0xf]  ;;  %v2150_v31 = vor.u32 %v2992_v23, %v2149_v22  ;;  %v2077_v32 = vld [vmem:[#allocation2 + $0x10] sm:$0xf] }
  0x1b   :  { %v2151_v30 = vld [vmem:[#allocation2 + $0xa8] sm:$0xf0]  ;;  %v2974_v33 = vld [vmem:[#allocation2 + $0x14] sm:$0xf0]  ;;  %v2141_v34 = vld [vmem:[#allocation2 + $0x90] sm:$0xf]  ;;  %v2090_v36 = vor.u32 %v2975_v26, %v2087_v28 }
  0x1c   :  { %439 = vmatpush.bf16.msrb.mxu3 %v2178_v1  ;;  %401 = vmatpush.bf16.msrb.mxu0 %v2102_v3  ;;  %v2990_v35 = vld [vmem:[#allocation2 + $0x94] sm:$0xf0]  ;;  %v2154_v37 = vor.u32 %v2991_v29, %v2151_v30  ;;  %v2973_v38 = vld [vmem:[#allocation2 + $0x14] sm:$0xf]  ;;  %v2079_v39 = vld [vmem:[#allocation2 + $0x18] sm:$0xf0]  ;;  %v2078_v40 = vor.u32 %v2974_v33, %v2077_v32 }
  0x1d   :  { %414 = vmatpush.bf16.msrb.mxu1 %v2166_v7  ;;  %v2989_v41 = vld [vmem:[#allocation2 + $0x94] sm:$0xf]  ;;  %v2143_v42 = vld [vmem:[#allocation2 + $0x98] sm:$0xf0]  ;;  %v2069_v43 = vld [vmem:[#allocation2] sm:$0xf]  ;;  %v2142_v44 = vor.u32 %v2990_v35, %v2141_v34  ;;  %v2082_v52 = vor.u32 %v2973_v38, %v2079_v39 }
  0x1e   :  { %427 = vmatpush.bf16.msrb.mxu2 %v2106_v12  ;;  %v2972_v45 = vld [vmem:[#allocation2 + $0x4] sm:$0xf0]  ;;  %v2133_v46 = vld [vmem:[#allocation2 + $0x80] sm:$0xf]  ;;  %v2971_v48 = vld [vmem:[#allocation2 + $0x4] sm:$0xf]  ;;  %v2146_v53 = vor.u32 %v2989_v41, %v2143_v42 }
  0x1f   :  { %v2988_v47 = vld [vmem:[#allocation2 + $0x84] sm:$0xf0]  ;;  %v2071_v49 = vld [vmem:[#allocation2 + $0x8] sm:$0xf0]  ;;  %v2253_v50 = vld [vmem:[#allocation2 + $0x370] sm:$0xf]  ;;  %v2070_v56 = vor.u32 %v2972_v45, %v2069_v43 }
  0x20   :  { %440 = vmatpush.bf16.msrb.mxu3 %v2170_v13  ;;  %402 = vmatpush.bf16.msrb.mxu0 %v2094_v15  ;;  %v3018_v51 = vld [vmem:[#allocation2 + $0x374] sm:$0xf0]  ;;  %v2317_v54 = vld [vmem:[#allocation2 + $0x3f0] sm:$0xf]  ;;  %v2987_v57 = vld [vmem:[#allocation2 + $0x84] sm:$0xf]  ;;  %v2134_v60 = vor.u32 %v2988_v47, %v2133_v46  ;;  %v2074_v4 = vor.u32 %v2971_v48, %v2071_v49 }
  0x21   :  { %415 = vmatpush.bf16.msrb.mxu1 %v2158_v19  ;;  %v3034_v55 = vld [vmem:[#allocation2 + $0x3f4] sm:$0xf0]  ;;  %v2135_v58 = vld [vmem:[#allocation2 + $0x88] sm:$0xf0]  ;;  %v3017_v59 = vld [vmem:[#allocation2 + $0x374] sm:$0xf]  ;;  %v2254_v61 = vor.u32 %v3018_v51, %v2253_v50 }
  0x22   :  { %428 = vmatpush.bf16.msrb.mxu2 %v2098_v24  ;;  %v2255_v62 = vld [vmem:[#allocation2 + $0x378] sm:$0xf0]  ;;  %v3033_v63 = vld [vmem:[#allocation2 + $0x3f4] sm:$0xf]  ;;  %v2318_v1 = vor.u32 %v3034_v55, %v2317_v54  ;;  %v2245_v2 = vld [vmem:[#allocation2 + $0x360] sm:$0xf]  ;;  %v2138_v5 = vor.u32 %v2987_v57, %v2135_v58 }
  0x23   :  { %v2319_v0 = vld [vmem:[#allocation2 + $0x3f8] sm:$0xf0]  ;;  %v3016_v3 = vld [vmem:[#allocation2 + $0x364] sm:$0xf0]  ;;  %v2309_v6 = vld [vmem:[#allocation2 + $0x3e0] sm:$0xf]  ;;  %v2258_v8 = vor.u32 %v3017_v59, %v2255_v62 }
  0x24   :  { %441 = vmatpush.bf16.msrb.mxu3 %v2162_v25  ;;  %403 = vmatpush.bf16.msrb.mxu0 %v2086_v27  ;;  %v3032_v7 = vld [vmem:[#allocation2 + $0x3e4] sm:$0xf0]  ;;  %v2322_v9 = vor.u32 %v3033_v63, %v2319_v0  ;;  %v3015_v10 = vld [vmem:[#allocation2 + $0x364] sm:$0xf]  ;;  %v2246_v11 = vor.u32 %v3016_v3, %v2245_v2  ;;  %v2247_v12 = vld [vmem:[#allocation2 + $0x368] sm:$0xf0] }
  0x25   :  { %416 = vmatpush.bf16.msrb.mxu1 %v2150_v31  ;;  %v3031_v13 = vld [vmem:[#allocation2 + $0x3e4] sm:$0xf]  ;;  %v2311_v14 = vld [vmem:[#allocation2 + $0x3e8] sm:$0xf0]  ;;  %v2310_v15 = vor.u32 %v3032_v7, %v2309_v6  ;;  %v2250_v16 = vor.u32 %v3015_v10, %v2247_v12  ;;  %v2237_v18 = vld [vmem:[#allocation2 + $0x350] sm:$0xf] }
  0x26   :  { %429 = vmatpush.bf16.msrb.mxu2 %v2090_v36  ;;  %v2314_v17 = vor.u32 %v3031_v13, %v2311_v14  ;;  %v3014_v19 = vld [vmem:[#allocation2 + $0x354] sm:$0xf0]  ;;  %v2301_v20 = vld [vmem:[#allocation2 + $0x3d0] sm:$0xf]  ;;  %v3013_v23 = vld [vmem:[#allocation2 + $0x354] sm:$0xf] }
  0x27   :  { %v2238_v21 = vor.u32 %v3014_v19, %v2237_v18  ;;  %v3030_v22 = vld [vmem:[#allocation2 + $0x3d4] sm:$0xf0]  ;;  %v2239_v24 = vld [vmem:[#allocation2 + $0x358] sm:$0xf0]  ;;  %v3029_v27 = vld [vmem:[#allocation2 + $0x3d4] sm:$0xf] }
  0x28   :  { %442 = vmatpush.bf16.msrb.mxu3 %v2154_v37  ;;  %404 = vmatpush.bf16.msrb.mxu0 %v2078_v40  ;;  %v2302_v25 = vor.u32 %v3030_v22, %v2301_v20  ;;  %v2242_v26 = vor.u32 %v3013_v23, %v2239_v24  ;;  %v2303_v28 = vld [vmem:[#allocation2 + $0x3d8] sm:$0xf0]  ;;  %v2229_v30 = vld [vmem:[#allocation2 + $0x340] sm:$0xf]  ;;  %v3012_v31 = vld [vmem:[#allocation2 + $0x344] sm:$0xf0] }
  0x29   :  { %417 = vmatpush.bf16.msrb.mxu1 %v2142_v44  ;;  %v2306_v29 = vor.u32 %v3029_v27, %v2303_v28  ;;  %v2293_v32 = vld [vmem:[#allocation2 + $0x3c0] sm:$0xf]  ;;  %v2230_v33 = vor.u32 %v3012_v31, %v2229_v30  ;;  %v3028_v34 = vld [vmem:[#allocation2 + $0x3c4] sm:$0xf0]  ;;  %v3011_v35 = vld [vmem:[#allocation2 + $0x344] sm:$0xf] }
  0x2a   :  { %430 = vmatpush.bf16.msrb.mxu2 %v2082_v52  ;;  %v2231_v36 = vld [vmem:[#allocation2 + $0x348] sm:$0xf0]  ;;  %v2294_v37 = vor.u32 %v3028_v34, %v2293_v32  ;;  %v3027_v39 = vld [vmem:[#allocation2 + $0x3c4] sm:$0xf]  ;;  %v2221_v42 = vld [vmem:[#allocation2 + $0x330] sm:$0xf] }
  0x2b   :  { %v2234_v38 = vor.u32 %v3011_v35, %v2231_v36  ;;  %v2295_v40 = vld [vmem:[#allocation2 + $0x3c8] sm:$0xf0]  ;;  %v3010_v43 = vld [vmem:[#allocation2 + $0x334] sm:$0xf0]  ;;  %v2285_v44 = vld [vmem:[#allocation2 + $0x3b0] sm:$0xf] }
  0x2c   :  { %443 = vmatpush.bf16.msrb.mxu3 %v2146_v53  ;;  %405 = vmatpush.bf16.msrb.mxu0 %v2070_v56  ;;  %v2298_v41 = vor.u32 %v3027_v39, %v2295_v40  ;;  %v2222_v45 = vor.u32 %v3010_v43, %v2221_v42  ;;  %v3026_v46 = vld [vmem:[#allocation2 + $0x3b4] sm:$0xf0]  ;;  %v3009_v47 = vld [vmem:[#allocation2 + $0x334] sm:$0xf]  ;;  %v2223_v48 = vld [vmem:[#allocation2 + $0x338] sm:$0xf0] }
  0x2d   :  { %418 = vmatpush.bf16.msrb.mxu1 %v2134_v60  ;;  %v2286_v49 = vor.u32 %v3026_v46, %v2285_v44  ;;  %v2226_v50 = vor.u32 %v3009_v47, %v2223_v48  ;;  %v3025_v51 = vld [vmem:[#allocation2 + $0x3b4] sm:$0xf]  ;;  %v2287_v52 = vld [vmem:[#allocation2 + $0x3b8] sm:$0xf0]  ;;  %v2213_v54 = vld [vmem:[#allocation2 + $0x320] sm:$0xf] }
  0x2e   :  { %431 = vmatpush.bf16.msrb.mxu2 %v2074_v4  ;;  %v2290_v53 = vor.u32 %v3025_v51, %v2287_v52  ;;  %v3008_v55 = vld [vmem:[#allocation2 + $0x324] sm:$0xf0]  ;;  %v2277_v57 = vld [vmem:[#allocation2 + $0x3a0] sm:$0xf]  ;;  %v3007_v59 = vld [vmem:[#allocation2 + $0x324] sm:$0xf] }
  0x2f   :  { %v2214_v56 = vor.u32 %v3008_v55, %v2213_v54  ;;  %v3024_v58 = vld [vmem:[#allocation2 + $0x3a4] sm:$0xf0]  ;;  %v3023_v62 = vld [vmem:[#allocation2 + $0x3a4] sm:$0xf]  ;;  %v2279_v0 = vld [vmem:[#allocation2 + $0x3a8] sm:$0xf0] }
  0x30   :  { %620 = vmatpush.bf16.msra.mxu0 %v2254_v61  ;;  %444 = vmatpush.bf16.msrb.mxu3 %v2138_v5  ;;  %v2278_v60 = vor.u32 %v3024_v58, %v2277_v57  ;;  %v2215_v61 = vld [vmem:[#allocation2 + $0x328] sm:$0xf0]  ;;  %v2205_v2 = vld [vmem:[#allocation2 + $0x310] sm:$0xf]  ;;  %v3006_v3 = vld [vmem:[#allocation2 + $0x314] sm:$0xf0] }
  0x31   :  { %633 = vmatpush.bf16.msra.mxu1 %v2318_v1  ;;  %v2218_v63 = vor.u32 %v3007_v59, %v2215_v61  ;;  %v2282_v1 = vor.u32 %v3023_v62, %v2279_v0  ;;  %v2269_v4 = vld [vmem:[#allocation2 + $0x390] sm:$0xf]  ;;  %v2206_v5 = vor.u32 %v3006_v3, %v2205_v2  ;;  %v3022_v6 = vld [vmem:[#allocation2 + $0x394] sm:$0xf0]  ;;  %v3005_v7 = vld [vmem:[#allocation2 + $0x314] sm:$0xf] }
  0x32   :  { %646 = vmatpush.bf16.msra.mxu2 %v2258_v8  ;;  %v2207_v8 = vld [vmem:[#allocation2 + $0x318] sm:$0xf0]  ;;  %v2197_v14 = vld [vmem:[#allocation2 + $0x300] sm:$0xf]  ;;  %v3020_v18 = vld [vmem:[#allocation2 + $0x384] sm:$0xf0] }
  0x33   :  { %v2210_v10 = vor.u32 %v3005_v7, %v2207_v8  ;;  %v2271_v12 = vld [vmem:[#allocation2 + $0x398] sm:$0xf0]  ;;  %v3003_v19 = vld [vmem:[#allocation2 + $0x304] sm:$0xf]  ;;  %v2199_v20 = vld [vmem:[#allocation2 + $0x308] sm:$0xf0] }
  0x34   :  { %659 = vmatpush.bf16.msra.mxu3 %v2322_v9  ;;  %621 = vmatpush.bf16.msra.mxu0 %v2246_v11  ;;  %v2270_v9 = vor.u32 %v3022_v6, %v2269_v4  ;;  %v3021_v11 = vld [vmem:[#allocation2 + $0x394] sm:$0xf]  ;;  %v2202_v22 = vor.u32 %v3003_v19, %v2199_v20  ;;  %v3019_v23 = vld [vmem:[#allocation2 + $0x384] sm:$0xf]  ;;  %v2263_v24 = vld [vmem:[#allocation2 + $0x388] sm:$0xf0] }
  0x35   :  { %634 = vmatpush.bf16.msra.mxu1 %v2310_v15  ;;  %v2274_v13 = vor.u32 %v3021_v11, %v2271_v12  ;;  %v3004_v15 = vld [vmem:[#allocation2 + $0x304] sm:$0xf0]  ;;  %v3050_v34 = vld [vmem:[#allocation2 + $0x174] sm:$0xf0]  ;;  %v3049_v35 = vld [vmem:[#allocation2 + $0x174] sm:$0xf] }
  0x36   :  { %647 = vmatpush.bf16.msra.mxu2 %v2250_v16  ;;  %v2261_v16 = vld [vmem:[#allocation2 + $0x380] sm:$0xf]  ;;  %v111_v30 = vld [vmem:[%s3455_s4 + $0x8] sm:$0x3]  ;;  %v3066_v39 = vld [vmem:[#allocation2 + $0x1f4] sm:$0xf0] }
  0x37   :  { %v2447_v42 = vld [vmem:[#allocation2 + $0x1f8] sm:$0xf0]  ;;  %v2373_v48 = vld [vmem:[#allocation2 + $0x160] sm:$0xf]  ;;  %v3047_v51 = vld [vmem:[#allocation2 + $0x164] sm:$0xf] }
  0x38   :  { %660 = vmatpush.bf16.msra.mxu3 %v2314_v17  ;;  %622 = vmatpush.bf16.msra.mxu0 %v2238_v21  ;;  %v2198_v17 = vor.u32 %v3004_v15, %v2197_v14  ;;  %v2262_v21 = vor.u32 %v3020_v18, %v2261_v16  ;;  %v2375_v52 = vld [vmem:[#allocation2 + $0x168] sm:$0xf0]  ;;  %v2437_v55 = vld [vmem:[#allocation2 + $0x1e0] sm:$0xf]  ;;  %v3064_v57 = vld [vmem:[#allocation2 + $0x1e4] sm:$0xf0] }
  0x39   :  { %635 = vmatpush.bf16.msra.mxu1 %v2302_v25  ;;  %v2266_v25 = vor.u32 %v3019_v23, %v2263_v24  ;;  %v3063_v58 = vld [vmem:[#allocation2 + $0x1e4] sm:$0xf]  ;;  %v2439_v59 = vld [vmem:[#allocation2 + $0x1e8] sm:$0xf0]  ;;  %v114_v61 = vperm.slane %v111_v30, 1  ;;  %v2438_v6 = vor.u32 %v3064_v57, %v2437_v55  ;;  %vm2020_vm1 = vcmask 15360  }
  0x3a   :  { %648 = vmatpush.bf16.msra.mxu2 %v2242_v26  ;;  %v46_v26 = vld [vmem:[%s3455_s4] sm:$0x3]  ;;  %v2365_v2 = vld [vmem:[#allocation2 + $0x150] sm:$0xf]  ;;  %v3046_v3 = vld [vmem:[#allocation2 + $0x154] sm:$0xf0]  ;;  %v2442_v7 = vor.u32 %v3063_v58, %v2439_v59 }
  0x3b   :  { %v48_v27 = vperm.slane %v46_v26, 0  ;;  %v49_v28 = vperm.slane %v46_v26, 1  ;;  %v3045_v4 = vld [vmem:[#allocation2 + $0x154] sm:$0xf]  ;;  %v2429_v8 = vld [vmem:[#allocation2 + $0x1d0] sm:$0xf]  ;;  %v2366_v14 = vor.u32 %v3046_v3, %v2365_v2 }
  0x3c   :  { %661 = vmatpush.bf16.msra.mxu3 %v2306_v29  ;;  %623 = vmatpush.bf16.msra.mxu0 %v2230_v33  ;;  %v2381_v33 = vld [vmem:[#allocation2 + $0x170] sm:$0xf]  ;;  %v3061_v11 = vld [vmem:[#allocation2 + $0x1d4] sm:$0xf]  ;;  %v2431_v12 = vld [vmem:[#allocation2 + $0x1d8] sm:$0xf0] }
  0x3d   :  { %636 = vmatpush.bf16.msra.mxu1 %v2294_v37  ;;  %v2383_v37 = vld [vmem:[#allocation2 + $0x178] sm:$0xf0]  ;;  %v2382_v46 = vor.u32 %v3050_v34, %v2381_v33  ;;  %v2357_v16 = vld [vmem:[#allocation2 + $0x140] sm:$0xf]  ;;  %v3043_v18 = vld [vmem:[#allocation2 + $0x144] sm:$0xf] }
  0x3e   :  { %649 = vmatpush.bf16.msra.mxu2 %v2234_v38  ;;  %v2445_v38 = vld [vmem:[#allocation2 + $0x1f0] sm:$0xf]  ;;  %v2386_v47 = vor.u32 %v3049_v35, %v2383_v37  ;;  %v2359_v19 = vld [vmem:[#allocation2 + $0x148] sm:$0xf0]  ;;  %v3060_v23 = vld [vmem:[#allocation2 + $0x1c4] sm:$0xf0] }
  0x3f   :  { %v3059_v26 = vld [vmem:[#allocation2 + $0x1c4] sm:$0xf]  ;;  %v3042_v33 = vld [vmem:[#allocation2 + $0x134] sm:$0xf0]  ;;  %v3041_v34 = vld [vmem:[#allocation2 + $0x134] sm:$0xf] }
  0x40   :  { %662 = vmatpush.bf16.msra.mxu3 %v2298_v41  ;;  %624 = vmatpush.bf16.msra.mxu0 %v2222_v45  ;;  %v3065_v41 = vld [vmem:[#allocation2 + $0x1f4] sm:$0xf]  ;;  %v113_v45 = vperm.slane %v111_v30, 0  ;;  %v2351_v35 = vld [vmem:[#allocation2 + $0x138] sm:$0xf0] }
  0x41   :  { %637 = vmatpush.bf16.msra.mxu1 %v2286_v49  ;;  %v3048_v49 = vld [vmem:[#allocation2 + $0x164] sm:$0xf0]  ;;  %v2450_v54 = vor.u32 %v3065_v41, %v2447_v42  ;;  %v3057_v41 = vld [vmem:[#allocation2 + $0x1b4] sm:$0xf]  ;;  %v2415_v42 = vld [vmem:[#allocation2 + $0x1b8] sm:$0xf0] }
  0x42   :  { %650 = vmatpush.bf16.msra.mxu2 %v2226_v50  ;;  %v2374_v0 = vor.u32 %v3048_v49, %v2373_v48  ;;  %v3039_v48 = vld [vmem:[#allocation2 + $0x124] sm:$0xf]  ;;  %v2343_v49 = vld [vmem:[#allocation2 + $0x128] sm:$0xf0]  ;;  %v2333_v58 = vld [vmem:[#allocation2 + $0x110] sm:$0xf] }
  0x43   :  { %v2407_v55 = vld [vmem:[#allocation2 + $0x1a8] sm:$0xf0]  ;;  %v2346_v57 = vor.u32 %v3039_v48, %v2343_v49  ;;  %v3038_v59 = vld [vmem:[#allocation2 + $0x114] sm:$0xf0]  ;;  %v3053_v2 = vld [vmem:[#allocation2 + $0x194] sm:$0xf] }
  0x44   :  { %663 = vmatpush.bf16.msra.mxu3 %v2290_v53  ;;  %625 = vmatpush.bf16.msra.mxu0 %v2214_v56  ;;  %v2446_v53 = vor.u32 %v3066_v39, %v2445_v38  ;;  %v2413_v38 = vld [vmem:[#allocation2 + $0x1b0] sm:$0xf]  ;;  %v2399_v3 = vld [vmem:[#allocation2 + $0x198] sm:$0xf0]  ;;  %v2567_v48 = vld [vmem:[#allocation2 + $0x4e8] sm:$0xf0] }
  0x45   :  { %638 = vmatpush.bf16.msra.mxu1 %v2278_v60 }
  0x46   :  { %651 = vmatpush.bf16.msra.mxu2 %v2218_v63 }
  0x48   :  { %664 = vmatpush.bf16.msra.mxu3 %v2282_v1  ;;  %626 = vmatpush.bf16.msra.mxu0 %v2206_v5  ;;  %v2378_v1 = vor.u32 %v3047_v51, %v2375_v52  ;;  %v2367_v5 = vld [vmem:[#allocation2 + $0x158] sm:$0xf0]  ;;  %v2418_v51 = vor.u32 %v3057_v41, %v2415_v42  ;;  %v2405_v52 = vld [vmem:[#allocation2 + $0x1a0] sm:$0xf] }
  0x49   :  { %639 = vmatpush.bf16.msra.mxu1 %v2270_v9  ;;  %v2370_v15 = vor.u32 %v3045_v4, %v2367_v5  ;;  %v2334_v4 = vor.u32 %v3038_v59, %v2333_v58  ;;  %v2495_v42 = vld [vmem:[#allocation2 + $0x458] sm:$0xf0]  ;;  %v3093_v59 = vld [vmem:[#allocation2 + $0x4d4] sm:$0xf] }
  0x4a   :  { %652 = vmatpush.bf16.msra.mxu2 %v2210_v10  ;;  %v3062_v10 = vld [vmem:[#allocation2 + $0x1d4] sm:$0xf0] }
  0x4b   :  { %v2430_v20 = vor.u32 %v3062_v10, %v2429_v8  ;;  %v3035_v8 = vld [vmem:[#allocation2 + $0x104] sm:$0xf]  ;;  %v2509_v10 = vld [vmem:[#allocation2 + $0x470] sm:$0xf] }
  0x4c   :  { %665 = vmatpush.bf16.msra.mxu3 %v2274_v13  ;;  %627 = vmatpush.bf16.msra.mxu0 %v2198_v17  ;;  %v3044_v17 = vld [vmem:[#allocation2 + $0x144] sm:$0xf0] }
  0x4d   :  { %640 = vmatpush.bf16.msra.mxu1 %v2262_v21  ;;  %v2434_v21 = vor.u32 %v3061_v11, %v2431_v12  ;;  %v2358_v30 = vor.u32 %v3044_v17, %v2357_v16  ;;  %v3082_v11 = vld [vmem:[#allocation2 + $0x474] sm:$0xf0]  ;;  %v2389_v16 = vld [vmem:[#allocation2 + $0x180] sm:$0xf]  ;;  %v3052_v17 = vld [vmem:[#allocation2 + $0x184] sm:$0xf0] }
  0x4e   :  { %653 = vmatpush.bf16.msra.mxu2 %v2202_v22  ;;  %v2421_v22 = vld [vmem:[#allocation2 + $0x1c0] sm:$0xf] }
  0x50   :  { %666 = vmatpush.bf16.msra.mxu3 %v2266_v25 }
  0x8c   :  { %v85_v29 = vpop.f32.mrf.mxu0 }
  0x8d   :  { %v86_v31 = vadd.f32 %v85_v29, %v48_v27  ;;  %v2423_v27 = vld [vmem:[#allocation2 + $0x1c8] sm:$0xf0] }
  0x8e   :  { %v2426_v37 = vor.u32 %v3059_v26, %v2423_v27  ;;  %v3079_v26 = vld [vmem:[#allocation2 + $0x464] sm:$0xf]  ;;  %v2503_v27 = vld [vmem:[#allocation2 + $0x468] sm:$0xf0] }
  0x8f   :  { %v98_v32 = vpop.f32.mrf.mxu1  ;;  %v102_v40 = vmax.f32 %v86_v31, 0.0  ;;  %v2362_v31 = vor.u32 %v3043_v18, %v2359_v19  ;;  %v3051_v18 = vld [vmem:[#allocation2 + $0x184] sm:$0xf]  ;;  %v2391_v19 = vld [vmem:[#allocation2 + $0x188] sm:$0xf0] }
  0x90   :  { %v99_v36 = vadd.f32 %v98_v32, %v49_v28  ;;  %v2349_v32 = vld [vmem:[#allocation2 + $0x130] sm:$0xf] }
  0x91   :  { %v104_v44 = vpack.c.bf16 %v102_v40, %v102_v40  ;;  %v3058_v40 = vld [vmem:[#allocation2 + $0x1b4] sm:$0xf0] }
  0x92   :  { %v103_v43 = vmax.f32 %v99_v36, 0.0  ;;  %v2422_v36 = vor.u32 %v3060_v23, %v2421_v22  ;;  %v2510_v22 = vor.u32 %v3082_v11, %v2509_v10  ;;  %v2469_v10 = vld [vmem:[#allocation2 + $0x420] sm:$0xf]  ;;  %v3072_v11 = vld [vmem:[#allocation2 + $0x424] sm:$0xf0] }
  0x93   :  { %406 = vmatmul.bf16.vlgmr.msrb.gmra.mxu0 %v104_v44  ;;  %432 = vmatmul.bf16.vlgmr.msrb.gmra.mxu2 %v104_v44  ;;  %v2350_v44 = vor.u32 %v3042_v33, %v2349_v32  ;;  %v2573_v32 = vld [vmem:[#allocation2 + $0x4f0] sm:$0xf]  ;;  %v3098_v33 = vld [vmem:[#allocation2 + $0x4f4] sm:$0xf0] }
  0x94   :  { %v105_v50 = vpack.c.bf16 %v103_v43, %v103_v43  ;;  %v146_v56 = vpop.f32.mrf.mxu2  ;;  %v87_v60 = vpop.f32.mrf.mxu0  ;;  %908 = vmatpush.bf16.msrb.mxu0 %v2382_v46  ;;  %934 = vmatpush.bf16.msrb.mxu2 %v2386_v47  ;;  %v2341_v46 = vld [vmem:[#allocation2 + $0x120] sm:$0xf]  ;;  %v3040_v47 = vld [vmem:[#allocation2 + $0x124] sm:$0xf0] }
  0x95   :  { %v147_v9 = vadd.f32 %v146_v56, %v113_v45  ;;  %v2354_v45 = vor.u32 %v3041_v34, %v2351_v35  ;;  %v2342_v56 = vor.u32 %v3040_v47, %v2341_v46  ;;  %v3037_v60 = vld [vmem:[#allocation2 + $0x114] sm:$0xf]  ;;  %v2574_v35 = vor.u32 %v3098_v33, %v2573_v32  ;;  %v3095_v46 = vld [vmem:[#allocation2 + $0x4e4] sm:$0xf]  ;;  %v2535_v32 = vld [vmem:[#allocation2 + $0x4a8] sm:$0xf0] }
  0x96   :  { %419 = vmatmul.bf16.vlgmr.msrb.gmra.mxu1 %v105_v50  ;;  %445 = vmatmul.bf16.vlgmr.msrb.gmra.mxu3 %v105_v50  ;;  %v159_v63 = vpop.f32.mrf.mxu3  ;;  %v2414_v50 = vor.u32 %v3058_v40, %v2413_v38  ;;  %v3097_v34 = vld [vmem:[#allocation2 + $0x4f4] sm:$0xf]  ;;  %v2493_v38 = vld [vmem:[#allocation2 + $0x450] sm:$0xf]  ;;  %v2570_v49 = vor.u32 %v3095_v46, %v2567_v48  ;;  %v232_v46 = vld [vmem:[%s3455_s4 + $0x2] sm:$0x3] }
  0x97   :  { %v100_v62 = vpop.f32.mrf.mxu1  ;;  %921 = vmatpush.bf16.msrb.mxu1 %v2446_v53  ;;  %947 = vmatpush.bf16.msrb.mxu3 %v2450_v54  ;;  %v160_v13 = vadd.f32 %v159_v63, %v114_v61  ;;  %v163_v24 = vmax.f32 %v147_v9, 0.0  ;;  %v3056_v53 = vld [vmem:[#allocation2 + $0x1a4] sm:$0xf0]  ;;  %v3055_v54 = vld [vmem:[#allocation2 + $0x1a4] sm:$0xf] }
  0x98   :  { %909 = vmatpush.bf16.msrb.mxu0 %v2374_v0  ;;  %935 = vmatpush.bf16.msrb.mxu2 %v2378_v1  ;;  %v2335_v61 = vld [vmem:[#allocation2 + $0x118] sm:$0xf0]  ;;  %v2406_v62 = vor.u32 %v3056_v53, %v2405_v52  ;;  %v2410_v63 = vor.u32 %v3055_v54, %v2407_v55  ;;  %v2397_v0 = vld [vmem:[#allocation2 + $0x190] sm:$0xf]  ;;  %v3054_v1 = vld [vmem:[#allocation2 + $0x194] sm:$0xf0] }
  0x99   :  { %v164_v28 = vmax.f32 %v160_v13, 0.0  ;;  %v165_v39 = vpack.c.bf16 %v163_v24, %v163_v24  ;;  %v2338_v5 = vor.u32 %v3037_v60, %v2335_v61  ;;  %v2327_v9 = vld [vmem:[#allocation2 + $0x108] sm:$0xf0]  ;;  %v2398_v12 = vor.u32 %v3054_v1, %v2397_v0  ;;  %v2501_v24 = vld [vmem:[#allocation2 + $0x460] sm:$0xf] }
  0x9a   :  { %v2402_v13 = vor.u32 %v3053_v2, %v2399_v3  ;;  %v3077_v40 = vld [vmem:[#allocation2 + $0x454] sm:$0xf]  ;;  %v3075_v52 = vld [vmem:[#allocation2 + $0x444] sm:$0xf]  ;;  %v2487_v54 = vld [vmem:[#allocation2 + $0x448] sm:$0xf0] }
  0x9b   :  { %922 = vmatpush.bf16.msrb.mxu1 %v2438_v6  ;;  %948 = vmatpush.bf16.msrb.mxu3 %v2442_v7  ;;  %v166_v43 = vpack.c.bf16 %v164_v28, %v164_v28  ;;  %v2325_v6 = vld [vmem:[#allocation2 + $0x100] sm:$0xf]  ;;  %v3036_v7 = vld [vmem:[#allocation2 + $0x104] sm:$0xf0]  ;;  %v2390_v28 = vor.u32 %v3052_v17, %v2389_v16  ;;  %v2490_v55 = vor.u32 %v3075_v52, %v2487_v54  ;;  %v2559_v60 = vld [vmem:[#allocation2 + $0x4d8] sm:$0xf0] }
  0x9c   :  { %v148_v25 = vpop.f32.mrf.mxu2  ;;  %910 = vmatpush.bf16.msrb.mxu0 %v2366_v14  ;;  %936 = vmatpush.bf16.msrb.mxu2 %v2370_v15  ;;  %v3081_v14 = vld [vmem:[#allocation2 + $0x474] sm:$0xf]  ;;  %v2511_v15 = vld [vmem:[#allocation2 + $0x478] sm:$0xf0]  ;;  %v2562_v61 = vor.u32 %v3093_v59, %v2559_v60  ;;  %v2541_v16 = vld [vmem:[#allocation2 + $0x4b0] sm:$0xf] }
  0x9d   :  { %v2514_v23 = vor.u32 %v3081_v14, %v2511_v15  ;;  %v3080_v25 = vld [vmem:[#allocation2 + $0x464] sm:$0xf0]  ;;  %v3073_v0 = vld [vmem:[#allocation2 + $0x434] sm:$0xf]  ;;  %v2479_v2 = vld [vmem:[#allocation2 + $0x438] sm:$0xf0] }
  0x9e   :  { %v161_v29 = vpop.f32.mrf.mxu3  ;;  %v2482_v3 = vor.u32 %v3073_v0, %v2479_v2  ;;  %v2471_v14 = vld [vmem:[#allocation2 + $0x428] sm:$0xf0]  ;;  %v3090_v17 = vld [vmem:[#allocation2 + $0x4b4] sm:$0xf0]  ;;  %v3084_v48 = vld [vmem:[#allocation2 + $0x484] sm:$0xf0] }
  0x9f   :  { %923 = vmatpush.bf16.msrb.mxu1 %v2430_v20  ;;  %949 = vmatpush.bf16.msrb.mxu3 %v2434_v21  ;;  %v2326_v20 = vor.u32 %v3036_v7, %v2325_v6  ;;  %v2330_v21 = vor.u32 %v3035_v8, %v2327_v9  ;;  %v2394_v29 = vor.u32 %v3051_v18, %v2391_v19  ;;  %v3091_v6 = vld [vmem:[#allocation2 + $0x4c4] sm:$0xf]  ;;  %v2551_v8 = vld [vmem:[#allocation2 + $0x4c8] sm:$0xf0]  ;;  %v3089_v18 = vld [vmem:[#allocation2 + $0x4b4] sm:$0xf] }
  0xa0   :  { %911 = vmatpush.bf16.msrb.mxu0 %v2358_v30  ;;  %937 = vmatpush.bf16.msrb.mxu2 %v2362_v31  ;;  %v2502_v30 = vor.u32 %v3080_v25, %v2501_v24  ;;  %v2506_v31 = vor.u32 %v3079_v26, %v2503_v27  ;;  %v2554_v9 = vor.u32 %v3091_v6, %v2551_v8  ;;  %v3069_v25 = vld [vmem:[#allocation2 + $0x414] sm:$0xf]  ;;  %v2463_v26 = vld [vmem:[#allocation2 + $0x418] sm:$0xf0]  ;;  %v3114_v60 = vld [vmem:[#allocation2 + $0x274] sm:$0xf0] }
  0xa1   :  { %v2542_v19 = vor.u32 %v3090_v17, %v2541_v16  ;;  %v2466_v27 = vor.u32 %v3069_v25, %v2463_v26  ;;  %v3111_v8 = vld [vmem:[#allocation2 + $0x264] sm:$0xf]  ;;  %v3129_v16 = vld [vmem:[#allocation2 + $0x2f4] sm:$0xf]  ;;  %v2703_v17 = vld [vmem:[#allocation2 + $0x2f8] sm:$0xf0] }
  0xa3   :  { %924 = vmatpush.bf16.msrb.mxu1 %v2422_v36  ;;  %950 = vmatpush.bf16.msrb.mxu3 %v2426_v37  ;;  %v2575_v36 = vld [vmem:[#allocation2 + $0x4f8] sm:$0xf0] }
  0xa4   :  { %628 = vmatmul.bf16.vlgmr.msra.gmra.mxu0 %v165_v39  ;;  %654 = vmatmul.bf16.vlgmr.msra.gmra.mxu2 %v165_v39  ;;  %v2578_v37 = vor.u32 %v3097_v34, %v2575_v36  ;;  %v3078_v39 = vld [vmem:[#allocation2 + $0x454] sm:$0xf0]  ;;  %v2453_v34 = vld [vmem:[#allocation2 + $0x400] sm:$0xf]  ;;  %v3067_v36 = vld [vmem:[#allocation2 + $0x404] sm:$0xf] }
  0xa5   :  { %912 = vmatpush.bf16.msrb.mxu0 %v2350_v44  ;;  %938 = vmatpush.bf16.msrb.mxu2 %v2354_v45  ;;  %v2494_v41 = vor.u32 %v3078_v39, %v2493_v38  ;;  %v2565_v44 = vld [vmem:[#allocation2 + $0x4e0] sm:$0xf]  ;;  %v3096_v45 = vld [vmem:[#allocation2 + $0x4e4] sm:$0xf0]  ;;  %v2455_v38 = vld [vmem:[#allocation2 + $0x408] sm:$0xf0] }
  0xa6   :  { %641 = vmatmul.bf16.vlgmr.msra.gmra.mxu1 %v166_v43  ;;  %667 = vmatmul.bf16.vlgmr.msra.gmra.mxu3 %v166_v43  ;;  %v2498_v43 = vor.u32 %v3077_v40, %v2495_v42  ;;  %v2566_v47 = vor.u32 %v3096_v45, %v2565_v44  ;;  %v2458_v39 = vor.u32 %v3067_v36, %v2455_v38  ;;  %v2525_v40 = vld [vmem:[#allocation2 + $0x490] sm:$0xf]  ;;  %v2527_v44 = vld [vmem:[#allocation2 + $0x498] sm:$0xf0]  ;;  %v2613_v36 = vld [vmem:[#allocation2 + $0x240] sm:$0xf] }
  0xa7   :  { %925 = vmatpush.bf16.msrb.mxu1 %v2414_v50  ;;  %951 = vmatpush.bf16.msrb.mxu3 %v2418_v51  ;;  %v2485_v50 = vld [vmem:[#allocation2 + $0x440] sm:$0xf]  ;;  %v3076_v51 = vld [vmem:[#allocation2 + $0x444] sm:$0xf0] }
  0xa8   :  { %v2486_v53 = vor.u32 %v3076_v51, %v2485_v50  ;;  %v2519_v51 = vld [vmem:[#allocation2 + $0x488] sm:$0xf0]  ;;  %v3108_v38 = vld [vmem:[#allocation2 + $0x244] sm:$0xf0] }
  0xa9   :  { %913 = vmatpush.bf16.msrb.mxu0 %v2342_v56  ;;  %939 = vmatpush.bf16.msrb.mxu2 %v2346_v57  ;;  %v2557_v56 = vld [vmem:[#allocation2 + $0x4d0] sm:$0xf]  ;;  %v3094_v57 = vld [vmem:[#allocation2 + $0x4d4] sm:$0xf0] }
  0xaa   :  { %v2558_v58 = vor.u32 %v3094_v57, %v2557_v56  ;;  %v235_v57 = vperm.slane %v232_v46, 1 }
  0xab   :  { %926 = vmatpush.bf16.msrb.mxu1 %v2406_v62  ;;  %952 = vmatpush.bf16.msrb.mxu3 %v2410_v63  ;;  %v2477_v62 = vld [vmem:[#allocation2 + $0x430] sm:$0xf]  ;;  %v3074_v63 = vld [vmem:[#allocation2 + $0x434] sm:$0xf0] }
  0xac   :  { %v2478_v1 = vor.u32 %v3074_v63, %v2477_v62  ;;  %v2639_v62 = vld [vmem:[#allocation2 + $0x278] sm:$0xf0] }
  0xad   :  { %914 = vmatpush.bf16.msrb.mxu0 %v2334_v4  ;;  %940 = vmatpush.bf16.msrb.mxu2 %v2338_v5  ;;  %v2549_v4 = vld [vmem:[#allocation2 + $0x4c0] sm:$0xf]  ;;  %v3092_v5 = vld [vmem:[#allocation2 + $0x4c4] sm:$0xf0] }
  0xae   :  { %v2550_v7 = vor.u32 %v3092_v5, %v2549_v4 }
  0xaf   :  { %927 = vmatpush.bf16.msrb.mxu1 %v2398_v12  ;;  %953 = vmatpush.bf16.msrb.mxu3 %v2402_v13  ;;  %v3071_v12 = vld [vmem:[#allocation2 + $0x424] sm:$0xf]  ;;  %v2470_v13 = vor.u32 %v3072_v11, %v2469_v10  ;;  %v3333_v11 = vld [vmem:[%s3455_s4 + $0xa] sm:$0x3] }
  0xb0   :  { %v2474_v15 = vor.u32 %v3071_v12, %v2471_v14  ;;  %v2701_v12 = vld [vmem:[#allocation2 + $0x2f0] sm:$0xf]  ;;  %v456_v25 = vperm.slane %v3333_v11, 0 }
  0xb1   :  { %915 = vmatpush.bf16.msrb.mxu0 %v2326_v20  ;;  %941 = vmatpush.bf16.msrb.mxu2 %v2330_v21  ;;  %v2543_v20 = vld [vmem:[#allocation2 + $0x4b8] sm:$0xf0] }
  0xb2   :  { %v2546_v21 = vor.u32 %v3089_v18, %v2543_v20  ;;  %v2621_v20 = vld [vmem:[#allocation2 + $0x250] sm:$0xf] }
  0xb3   :  { %928 = vmatpush.bf16.msrb.mxu1 %v2390_v28  ;;  %954 = vmatpush.bf16.msrb.mxu3 %v2394_v29  ;;  %v2533_v28 = vld [vmem:[#allocation2 + $0x4a0] sm:$0xf]  ;;  %v3088_v29 = vld [vmem:[#allocation2 + $0x4a4] sm:$0xf0] }
  0xb5   :  { %1130 = vmatpush.bf16.msra.mxu0 %v2510_v22  ;;  %1156 = vmatpush.bf16.msra.mxu2 %v2514_v23  ;;  %v2461_v22 = vld [vmem:[#allocation2 + $0x410] sm:$0xf]  ;;  %v3070_v23 = vld [vmem:[#allocation2 + $0x414] sm:$0xf0] }
  0xb6   :  { %v2462_v24 = vor.u32 %v3070_v23, %v2461_v22  ;;  %v3109_v23 = vld [vmem:[#allocation2 + $0x254] sm:$0xf] }
  0xb7   :  { %1143 = vmatpush.bf16.msra.mxu1 %v2574_v35  ;;  %1169 = vmatpush.bf16.msra.mxu3 %v2578_v37  ;;  %v3068_v35 = vld [vmem:[#allocation2 + $0x404] sm:$0xf0] }
  0xb8   :  { %v2454_v37 = vor.u32 %v3068_v35, %v2453_v34 }
  0xb9   :  { %1131 = vmatpush.bf16.msra.mxu0 %v2502_v30  ;;  %1157 = vmatpush.bf16.msra.mxu2 %v2506_v31  ;;  %v3087_v30 = vld [vmem:[#allocation2 + $0x4a4] sm:$0xf]  ;;  %v2534_v31 = vor.u32 %v3088_v29, %v2533_v28  ;;  %v2693_v28 = vld [vmem:[#allocation2 + $0x2e0] sm:$0xf] }
  0xba   :  { %v2538_v33 = vor.u32 %v3087_v30, %v2535_v32  ;;  %v3128_v30 = vld [vmem:[#allocation2 + $0x2e4] sm:$0xf0]  ;;  %v2695_v32 = vld [vmem:[#allocation2 + $0x2e8] sm:$0xf0] }
  0xbb   :  { %1144 = vmatpush.bf16.msra.mxu1 %v2566_v47  ;;  %1170 = vmatpush.bf16.msra.mxu3 %v2570_v49  ;;  %v2517_v47 = vld [vmem:[#allocation2 + $0x480] sm:$0xf]  ;;  %v3083_v49 = vld [vmem:[#allocation2 + $0x484] sm:$0xf] }
  0xbc   :  { %v2518_v50 = vor.u32 %v3084_v48, %v2517_v47  ;;  %v2522_v52 = vor.u32 %v3083_v49, %v2519_v51  ;;  %v3126_v47 = vld [vmem:[#allocation2 + $0x2d4] sm:$0xf0]  ;;  %v3125_v48 = vld [vmem:[#allocation2 + $0x2d4] sm:$0xf]  ;;  %v2687_v49 = vld [vmem:[#allocation2 + $0x2d8] sm:$0xf0]  ;;  %v2614_v51 = vor.u32 %v3108_v38, %v2613_v36 }
  0xbd   :  { %1132 = vmatpush.bf16.msra.mxu0 %v2494_v41  ;;  %1158 = vmatpush.bf16.msra.mxu2 %v2498_v43  ;;  %v3086_v41 = vld [vmem:[#allocation2 + $0x494] sm:$0xf0]  ;;  %v3085_v43 = vld [vmem:[#allocation2 + $0x494] sm:$0xf]  ;;  %v3100_v38 = vld [vmem:[#allocation2 + $0x204] sm:$0xf0] }
  0xbe   :  { %v2526_v42 = vor.u32 %v3086_v41, %v2525_v40  ;;  %v2530_v45 = vor.u32 %v3085_v43, %v2527_v44  ;;  %v2615_v40 = vld [vmem:[#allocation2 + $0x248] sm:$0xf0]  ;;  %v2685_v44 = vld [vmem:[#allocation2 + $0x2d0] sm:$0xf] }
  0xbf   :  { %1145 = vmatpush.bf16.msra.mxu1 %v2558_v58  ;;  %1171 = vmatpush.bf16.msra.mxu3 %v2562_v61  ;;  %v2637_v58 = vld [vmem:[#allocation2 + $0x270] sm:$0xf]  ;;  %v3113_v61 = vld [vmem:[#allocation2 + $0x274] sm:$0xf] }
  0xc0   :  { %v2642_v2 = vor.u32 %v3113_v61, %v2639_v62  ;;  %v3124_v61 = vld [vmem:[#allocation2 + $0x2c4] sm:$0xf0] }
  0xc1   :  { %1133 = vmatpush.bf16.msra.mxu0 %v2486_v53  ;;  %1159 = vmatpush.bf16.msra.mxu2 %v2490_v55  ;;  %v234_v53 = vperm.slane %v232_v46, 0 }
  0xc3   :  { %1146 = vmatpush.bf16.msra.mxu1 %v2550_v7  ;;  %1172 = vmatpush.bf16.msra.mxu3 %v2554_v9  ;;  %v3112_v7 = vld [vmem:[#allocation2 + $0x264] sm:$0xf0]  ;;  %v2631_v9 = vld [vmem:[#allocation2 + $0x268] sm:$0xf0] }
  0xc5   :  { %1134 = vmatpush.bf16.msra.mxu0 %v2478_v1  ;;  %1160 = vmatpush.bf16.msra.mxu2 %v2482_v3  ;;  %v2638_v1 = vor.u32 %v3114_v60, %v2637_v58  ;;  %v2629_v3 = vld [vmem:[#allocation2 + $0x260] sm:$0xf]  ;;  %v2686_v58 = vor.u32 %v3126_v47, %v2685_v44  ;;  %v2767_v47 = vld [vmem:[#allocation2 + $0x578] sm:$0xf0] }
  0xc6   :  { %v2630_v18 = vor.u32 %v3112_v7, %v2629_v3  ;;  %v2677_v60 = vld [vmem:[#allocation2 + $0x2c0] sm:$0xf] }
  0xc7   :  { %1147 = vmatpush.bf16.msra.mxu1 %v2542_v19  ;;  %1173 = vmatpush.bf16.msra.mxu3 %v2546_v21  ;;  %v2634_v19 = vor.u32 %v3111_v8, %v2631_v9  ;;  %v3110_v21 = vld [vmem:[#allocation2 + $0x254] sm:$0xf0]  ;;  %v3104_v8 = vld [vmem:[#allocation2 + $0x224] sm:$0xf0]  ;;  %v3103_v9 = vld [vmem:[#allocation2 + $0x224] sm:$0xf] }
  0xc8   :  { %v2622_v34 = vor.u32 %v3110_v21, %v2621_v20 }
  0xc9   :  { %1135 = vmatpush.bf16.msra.mxu0 %v2470_v13  ;;  %1161 = vmatpush.bf16.msra.mxu2 %v2474_v15  ;;  %v3130_v15 = vld [vmem:[#allocation2 + $0x2f4] sm:$0xf0] }
  0xca   :  { %v2702_v26 = vor.u32 %v3130_v15, %v2701_v12  ;;  %v2678_v12 = vor.u32 %v3124_v61, %v2677_v60  ;;  %v3143_v60 = vld [vmem:[#allocation2 + $0x564] sm:$0xf] }
  0xcb   :  { %1148 = vmatpush.bf16.msra.mxu1 %v2534_v31  ;;  %1174 = vmatpush.bf16.msra.mxu3 %v2538_v33  ;;  %v3127_v31 = vld [vmem:[#allocation2 + $0x2e4] sm:$0xf] }
  0xcc   :  { %v2698_v43 = vor.u32 %v3127_v31, %v2695_v32  ;;  %v3120_v31 = vld [vmem:[#allocation2 + $0x2a4] sm:$0xf0]  ;;  %v3119_v32 = vld [vmem:[#allocation2 + $0x2a4] sm:$0xf] }
  0xcd   :  { %1136 = vmatpush.bf16.msra.mxu0 %v2462_v24  ;;  %1162 = vmatpush.bf16.msra.mxu2 %v2466_v27  ;;  %v2623_v24 = vld [vmem:[#allocation2 + $0x258] sm:$0xf0]  ;;  %v2706_v27 = vor.u32 %v3129_v16, %v2703_v17  ;;  %v3122_v17 = vld [vmem:[#allocation2 + $0x2b4] sm:$0xf0] }
  0xce   :  { %v2626_v35 = vor.u32 %v3109_v23, %v2623_v24  ;;  %v3102_v23 = vld [vmem:[#allocation2 + $0x214] sm:$0xf0] }
  0xcf   :  { %1149 = vmatpush.bf16.msra.mxu1 %v2526_v42  ;;  %1175 = vmatpush.bf16.msra.mxu3 %v2530_v45  ;;  %v2694_v42 = vor.u32 %v3128_v30, %v2693_v28 }
  0xd1   :  { %1137 = vmatpush.bf16.msra.mxu0 %v2454_v37  ;;  %1163 = vmatpush.bf16.msra.mxu2 %v2458_v39  ;;  %v3107_v39 = vld [vmem:[#allocation2 + $0x244] sm:$0xf] }
  0xd3   :  { %1150 = vmatpush.bf16.msra.mxu1 %v2518_v50  ;;  %1176 = vmatpush.bf16.msra.mxu3 %v2522_v52  ;;  %v457_v50 = vperm.slane %v3333_v11, 1  ;;  %v2618_v52 = vor.u32 %v3107_v39, %v2615_v40  ;;  %v3099_v39 = vld [vmem:[#allocation2 + $0x204] sm:$0xf] }
 0x110   :  { %v407_v54 = vpop.f32.mrf.mxu0 }
 0x111   :  { %v408_v55 = vadd.f32 %v407_v54, %v234_v53  ;;  %v2605_v53 = vld [vmem:[#allocation2 + $0x230] sm:$0xf] }
 0x113   :  { %v420_v56 = vpop.f32.mrf.mxu1 }
 0x114   :  { %v421_v59 = vadd.f32 %v420_v56, %v408_v55  ;;  %v3106_v55 = vld [vmem:[#allocation2 + $0x234] sm:$0xf0]  ;;  %v3105_v56 = vld [vmem:[#allocation2 + $0x234] sm:$0xf] }
 0x116   :  { %v450_v63 = vmax.f32 %v421_v59, 0.0  ;;  %v433_v0 = vpop.f32.mrf.mxu2  ;;  %v2690_v59 = vor.u32 %v3125_v48, %v2687_v49  ;;  %v2653_v48 = vld [vmem:[#allocation2 + $0x290] sm:$0xf]  ;;  %v3118_v49 = vld [vmem:[#allocation2 + $0x294] sm:$0xf0] }
 0x117   :  { %v434_v5 = vadd.f32 %v433_v0, %v235_v57  ;;  %v2607_v57 = vld [vmem:[#allocation2 + $0x238] sm:$0xf0]  ;;  %v2679_v0 = vld [vmem:[#allocation2 + $0x2c8] sm:$0xf0] }
 0x118   :  { %v452_v4 = vpack.c.bf16 %v450_v63, %v450_v63  ;;  %v409_v10 = vpop.f32.mrf.mxu0  ;;  %v3123_v63 = vld [vmem:[#allocation2 + $0x2c4] sm:$0xf]  ;;  %v2610_v3 = vor.u32 %v3105_v56, %v2607_v57  ;;  %v2654_v56 = vor.u32 %v3118_v49, %v2653_v48  ;;  %v2725_v48 = vld [vmem:[#allocation2 + $0x520] sm:$0xf]  ;;  %v3136_v49 = vld [vmem:[#allocation2 + $0x524] sm:$0xf0] }
 0x119   :  { %v446_v6 = vpop.f32.mrf.mxu3  ;;  %v2599_v10 = vld [vmem:[#allocation2 + $0x228] sm:$0xf0] }
 0x11a   :  { %v447_v13 = vadd.f32 %v446_v6, %v434_v5  ;;  %916 = vmatmul.bf16.vlgmr.msrb.gmra.mxu0 %v452_v4  ;;  %942 = vmatmul.bf16.vlgmr.msrb.gmra.mxu2 %v452_v4  ;;  %v2597_v4 = vld [vmem:[#allocation2 + $0x220] sm:$0xf]  ;;  %v2602_v21 = vor.u32 %v3103_v9, %v2599_v10  ;;  %v2831_v9 = vld [vmem:[#allocation2 + $0x5f8] sm:$0xf0] }
 0x11b   :  { %v422_v14 = vpop.f32.mrf.mxu1  ;;  %1418 = vmatpush.bf16.msrb.mxu0 %v2638_v1  ;;  %1444 = vmatpush.bf16.msrb.mxu2 %v2642_v2  ;;  %v2606_v2 = vor.u32 %v3106_v55, %v2605_v53  ;;  %v2598_v20 = vor.u32 %v3104_v8, %v2597_v4  ;;  %v2647_v4 = vld [vmem:[#allocation2 + $0x288] sm:$0xf0]  ;;  %v3161_v8 = vld [vmem:[#allocation2 + $0x5f4] sm:$0xf] }
 0x11c   :  { %v451_v22 = vmax.f32 %v447_v13, 0.0  ;;  %v2682_v13 = vor.u32 %v3123_v63, %v2679_v0  ;;  %v2669_v14 = vld [vmem:[#allocation2 + $0x2b0] sm:$0xf]  ;;  %v2645_v63 = vld [vmem:[#allocation2 + $0x280] sm:$0xf] }
 0x11d   :  { %v3116_v0 = vld [vmem:[#allocation2 + $0x284] sm:$0xf0] }
 0x11e   :  { %v453_v29 = vpack.c.bf16 %v451_v22, %v451_v22  ;;  %v435_v33 = vpop.f32.mrf.mxu2  ;;  %v2589_v22 = vld [vmem:[#allocation2 + $0x210] sm:$0xf] }
 0x11f   :  { %1419 = vmatpush.bf16.msrb.mxu0 %v2630_v18  ;;  %1445 = vmatpush.bf16.msrb.mxu2 %v2634_v19  ;;  %v3121_v18 = vld [vmem:[#allocation2 + $0x2b4] sm:$0xf]  ;;  %v2671_v19 = vld [vmem:[#allocation2 + $0x2b8] sm:$0xf0]  ;;  %v2663_v33 = vld [vmem:[#allocation2 + $0x2a8] sm:$0xf0] }
 0x120   :  { %929 = vmatmul.bf16.vlgmr.msrb.gmra.mxu1 %v453_v29  ;;  %955 = vmatmul.bf16.vlgmr.msrb.gmra.mxu3 %v453_v29  ;;  %v2674_v28 = vor.u32 %v3121_v18, %v2671_v19  ;;  %v2661_v29 = vld [vmem:[#allocation2 + $0x2a0] sm:$0xf]  ;;  %v3160_v19 = vld [vmem:[#allocation2 + $0x5e4] sm:$0xf0] }
 0x121   :  { %v448_v37 = vpop.f32.mrf.mxu3  ;;  %v629_v41 = vpop.f32.mrf.mxu0  ;;  %1431 = vmatpush.bf16.msrb.mxu1 %v2702_v26  ;;  %1457 = vmatpush.bf16.msrb.mxu3 %v2706_v27  ;;  %v2591_v26 = vld [vmem:[#allocation2 + $0x218] sm:$0xf0]  ;;  %v2670_v27 = vor.u32 %v3122_v17, %v2669_v14  ;;  %v2662_v44 = vor.u32 %v3120_v31, %v2661_v29  ;;  %v3141_v14 = vld [vmem:[#allocation2 + $0x554] sm:$0xf]  ;;  %v2821_v18 = vld [vmem:[#allocation2 + $0x5e0] sm:$0xf] }
 0x122   :  { %v630_v45 = vadd.f32 %v629_v41, %v456_v25  ;;  %v3101_v25 = vld [vmem:[#allocation2 + $0x214] sm:$0xf]  ;;  %v2581_v37 = vld [vmem:[#allocation2 + $0x200] sm:$0xf]  ;;  %v2583_v41 = vld [vmem:[#allocation2 + $0x208] sm:$0xf0] }
 0x123   :  { %v642_v46 = vpop.f32.mrf.mxu1  ;;  %1420 = vmatpush.bf16.msrb.mxu0 %v2622_v34  ;;  %1446 = vmatpush.bf16.msrb.mxu2 %v2626_v35  ;;  %v2590_v35 = vor.u32 %v3102_v23, %v2589_v22  ;;  %v2594_v36 = vor.u32 %v3101_v25, %v2591_v26  ;;  %v2586_v53 = vor.u32 %v3099_v39, %v2583_v41  ;;  %v2823_v22 = vld [vmem:[#allocation2 + $0x5e8] sm:$0xf0]  ;;  %v3140_v25 = vld [vmem:[#allocation2 + $0x544] sm:$0xf0]  ;;  %v3139_v26 = vld [vmem:[#allocation2 + $0x544] sm:$0xf] }
 0x124   :  { %v643_v54 = vadd.f32 %v642_v46, %v630_v45  ;;  %v2666_v45 = vor.u32 %v3119_v32, %v2663_v33  ;;  %v3145_v46 = vld [vmem:[#allocation2 + $0x574] sm:$0xf]  ;;  %v3158_v31 = vld [vmem:[#allocation2 + $0x5d4] sm:$0xf0] }
 0x125   :  { %1432 = vmatpush.bf16.msrb.mxu1 %v2694_v42  ;;  %1458 = vmatpush.bf16.msrb.mxu3 %v2698_v43  ;;  %v2765_v42 = vld [vmem:[#allocation2 + $0x570] sm:$0xf]  ;;  %v3146_v43 = vld [vmem:[#allocation2 + $0x574] sm:$0xf0]  ;;  %v2770_v55 = vor.u32 %v3145_v46, %v2767_v47  ;;  %v3157_v32 = vld [vmem:[#allocation2 + $0x5d4] sm:$0xf] }
 0x126   :  { %v672_v62 = vmax.f32 %v643_v54, 0.0  ;;  %v2766_v54 = vor.u32 %v3146_v43, %v2765_v42  ;;  %v2805_v42 = vld [vmem:[#allocation2 + $0x5c0] sm:$0xf]  ;;  %v3156_v43 = vld [vmem:[#allocation2 + $0x5c4] sm:$0xf0] }
 0x127   :  { %v655_v1 = vpop.f32.mrf.mxu2  ;;  %1421 = vmatpush.bf16.msrb.mxu0 %v2614_v51  ;;  %1447 = vmatpush.bf16.msrb.mxu2 %v2618_v52  ;;  %v2655_v51 = vld [vmem:[#allocation2 + $0x298] sm:$0xf0]  ;;  %v2582_v52 = vor.u32 %v3100_v38, %v2581_v37  ;;  %v3138_v37 = vld [vmem:[#allocation2 + $0x534] sm:$0xf0]  ;;  %v3137_v38 = vld [vmem:[#allocation2 + $0x534] sm:$0xf] }
 0x128   :  { %v674_v5 = vpack.c.bf16 %v672_v62, %v672_v62  ;;  %v656_v6 = vadd.f32 %v655_v1, %v457_v50  ;;  %v3117_v50 = vld [vmem:[#allocation2 + $0x294] sm:$0xf]  ;;  %v2759_v62 = vld [vmem:[#allocation2 + $0x568] sm:$0xf0] }
 0x129   :  { %v668_v7 = vpop.f32.mrf.mxu3  ;;  %v631_v11 = vpop.f32.mrf.mxu0  ;;  %1433 = vmatpush.bf16.msrb.mxu1 %v2686_v58  ;;  %1459 = vmatpush.bf16.msrb.mxu3 %v2690_v59  ;;  %v2658_v57 = vor.u32 %v3117_v50, %v2655_v51  ;;  %v2757_v58 = vld [vmem:[#allocation2 + $0x560] sm:$0xf]  ;;  %v3144_v59 = vld [vmem:[#allocation2 + $0x564] sm:$0xf0]  ;;  %v2762_v1 = vor.u32 %v3143_v60, %v2759_v62  ;;  %v2807_v46 = vld [vmem:[#allocation2 + $0x5c8] sm:$0xf0]  ;;  %v2726_v50 = vor.u32 %v3136_v49, %v2725_v48 }
 0x12a   :  { %v669_v15 = vadd.f32 %v668_v7, %v656_v6  ;;  %1138 = vmatmul.bf16.vlgmr.msra.gmra.mxu0 %v674_v5  ;;  %1164 = vmatmul.bf16.vlgmr.msra.gmra.mxu2 %v674_v5  ;;  %v2758_v61 = vor.u32 %v3144_v59, %v2757_v58  ;;  %v2829_v5 = vld [vmem:[#allocation2 + $0x5f0] sm:$0xf]  ;;  %v3162_v7 = vld [vmem:[#allocation2 + $0x5f4] sm:$0xf0]  ;;  %v2834_v11 = vor.u32 %v3161_v8, %v2831_v9  ;;  %v3135_v51 = vld [vmem:[#allocation2 + $0x524] sm:$0xf] }
 0x12b   :  { %v644_v16 = vpop.f32.mrf.mxu1  ;;  %1422 = vmatpush.bf16.msrb.mxu0 %v2606_v2  ;;  %1448 = vmatpush.bf16.msrb.mxu2 %v2610_v3  ;;  %v2646_v2 = vor.u32 %v3116_v0, %v2645_v63  ;;  %v3115_v3 = vld [vmem:[#allocation2 + $0x284] sm:$0xf]  ;;  %v2830_v10 = vor.u32 %v3162_v7, %v2829_v5  ;;  %v2799_v58 = vld [vmem:[#allocation2 + $0x5b8] sm:$0xf0]  ;;  %v2717_v60 = vld [vmem:[#allocation2 + $0x510] sm:$0xf] }
 0x12c   :  { %v673_v24 = vmax.f32 %v669_v15, 0.0  ;;  %v2650_v6 = vor.u32 %v3115_v3, %v2647_v4  ;;  %v2751_v16 = vld [vmem:[#allocation2 + $0x558] sm:$0xf0]  ;;  %v3133_v62 = vld [vmem:[#allocation2 + $0x514] sm:$0xf] }
 0x12d   :  { %1434 = vmatpush.bf16.msrb.mxu1 %v2678_v12  ;;  %1460 = vmatpush.bf16.msrb.mxu3 %v2682_v13  ;;  %v2749_v12 = vld [vmem:[#allocation2 + $0x550] sm:$0xf]  ;;  %v3142_v13 = vld [vmem:[#allocation2 + $0x554] sm:$0xf0]  ;;  %v2754_v17 = vor.u32 %v3141_v14, %v2751_v16  ;;  %v2719_v0 = vld [vmem:[#allocation2 + $0x518] sm:$0xf0] }
 0x12e   :  { %v675_v30 = vpack.c.bf16 %v673_v24, %v673_v24  ;;  %v2750_v15 = vor.u32 %v3142_v13, %v2749_v12  ;;  %v2741_v24 = vld [vmem:[#allocation2 + $0x540] sm:$0xf]  ;;  %v3152_v3 = vld [vmem:[#allocation2 + $0x5a4] sm:$0xf0]  ;;  %v3151_v5 = vld [vmem:[#allocation2 + $0x5a4] sm:$0xf] }
 0x12f   :  { %v657_v34 = vpop.f32.mrf.mxu2  ;;  %1423 = vmatpush.bf16.msrb.mxu0 %v2598_v20  ;;  %1449 = vmatpush.bf16.msrb.mxu2 %v2602_v21  ;;  %v2822_v20 = vor.u32 %v3160_v19, %v2821_v18  ;;  %v3159_v21 = vld [vmem:[#allocation2 + $0x5e4] sm:$0xf]  ;;  %v2709_v8 = vld [vmem:[#allocation2 + $0x500] sm:$0xf]  ;;  %v3132_v9 = vld [vmem:[#allocation2 + $0x504] sm:$0xf0] }
 0x130   :  { %1151 = vmatmul.bf16.vlgmr.msra.gmra.mxu1 %v675_v30  ;;  %1177 = vmatmul.bf16.vlgmr.msra.gmra.mxu3 %v675_v30  ;;  %v2826_v23 = vor.u32 %v3159_v21, %v2823_v22  ;;  %v2813_v30 = vld [vmem:[#allocation2 + $0x5d0] sm:$0xf]  ;;  %v2815_v34 = vld [vmem:[#allocation2 + $0x5d8] sm:$0xf0]  ;;  %v2711_v12 = vld [vmem:[#allocation2 + $0x508] sm:$0xf0] }
 0x131   :  { %v670_v40 = vpop.f32.mrf.mxu3  ;;  %1435 = vmatpush.bf16.msrb.mxu1 %v2670_v27  ;;  %1461 = vmatpush.bf16.msrb.mxu3 %v2674_v28  ;;  %v2742_v27 = vor.u32 %v3140_v25, %v2741_v24  ;;  %v2743_v28 = vld [vmem:[#allocation2 + $0x548] sm:$0xf0]  ;;  %v2814_v33 = vor.u32 %v3158_v31, %v2813_v30  ;;  %v2781_v14 = vld [vmem:[#allocation2 + $0x590] sm:$0xf]  ;;  %v3149_v16 = vld [vmem:[#allocation2 + $0x594] sm:$0xf] }
 0x132   :  { %v2746_v29 = vor.u32 %v3139_v26, %v2743_v28  ;;  %v2735_v40 = vld [vmem:[#allocation2 + $0x538] sm:$0xf0]  ;;  %v2773_v21 = vld [vmem:[#allocation2 + $0x580] sm:$0xf]  ;;  %v3148_v22 = vld [vmem:[#allocation2 + $0x584] sm:$0xf0] }
 0x133   :  { %1424 = vmatpush.bf16.msrb.mxu0 %v2590_v35  ;;  %1450 = vmatpush.bf16.msrb.mxu2 %v2594_v36  ;;  %v2818_v35 = vor.u32 %v3157_v32, %v2815_v34  ;;  %v2733_v36 = vld [vmem:[#allocation2 + $0x530] sm:$0xf]  ;;  %v2738_v41 = vor.u32 %v3137_v38, %v2735_v40  ;;  %v2783_v18 = vld [vmem:[#allocation2 + $0x598] sm:$0xf0]  ;;  %v2774_v24 = vor.u32 %v3148_v22, %v2773_v21  ;;  %v2775_v25 = vld [vmem:[#allocation2 + $0x588] sm:$0xf0] }
 0x134   :  { %v2734_v39 = vor.u32 %v3138_v37, %v2733_v36  ;;  %v2786_v19 = vor.u32 %v3149_v16, %v2783_v18  ;;  %v3170_v36 = vld [vmem:[%s3454_s3 + $0x38] sm:$0xff]  ;;  %v3164_v16 = vld [vmem:[%s3454_s3 + $0x8] sm:$0xff]  ;;  %v3171_v21 = vld [vmem:[%s3454_s3 + $0x40] sm:$0xff] }
 0x135   :  { %1436 = vmatpush.bf16.msrb.mxu1 %v2662_v44  ;;  %1462 = vmatpush.bf16.msrb.mxu3 %v2666_v45  ;;  %v3155_v44 = vld [vmem:[#allocation2 + $0x5c4] sm:$0xf]  ;;  %v2806_v45 = vor.u32 %v3156_v43, %v2805_v42  ;;  %v964_v43 = vld [vmem:[%s3455_s4 + $0xc] sm:$0x3] }
 0x136   :  { %v2810_v47 = vor.u32 %v3155_v44, %v2807_v46  ;;  %v3169_v44 = vld [vmem:[%s3454_s3 + $0x30] sm:$0xff]  ;;  %v966_v49 = vperm.slane %v964_v43, 0  ;;  %v3184_v18 = vld [vmem:[%s3454_s3 + $0xa8] sm:$0xff]  ;;  %v3183_v22 = vld [vmem:[%s3454_s3 + $0xa0] sm:$0xff] }
 0x137   :  { %1425 = vmatpush.bf16.msrb.mxu0 %v2582_v52  ;;  %1451 = vmatpush.bf16.msrb.mxu2 %v2586_v53  ;;  %v2727_v52 = vld [vmem:[#allocation2 + $0x528] sm:$0xf0] }
 0x138   :  { %v2730_v53 = vor.u32 %v3135_v51, %v2727_v52  ;;  %v3177_v51 = vld [vmem:[%s3454_s3 + $0x70] sm:$0xff] }
 0x139   :  { %1437 = vmatpush.bf16.msrb.mxu1 %v2654_v56  ;;  %1463 = vmatpush.bf16.msrb.mxu3 %v2658_v57  ;;  %v3153_v56 = vld [vmem:[#allocation2 + $0x5b4] sm:$0xf] }
 0x13a   :  { %v2802_v59 = vor.u32 %v3153_v56, %v2799_v58  ;;  %v967_v56 = vperm.slane %v964_v43, 1 }
 0x13b   :  { %1639 = vmatpush.bf16.msra.mxu0 %v2766_v54  ;;  %1665 = vmatpush.bf16.msra.mxu2 %v2770_v55  ;;  %v2797_v54 = vld [vmem:[#allocation2 + $0x5b0] sm:$0xf]  ;;  %v3154_v55 = vld [vmem:[#allocation2 + $0x5b4] sm:$0xf0] }
 0x13c   :  { %v2798_v57 = vor.u32 %v3154_v55, %v2797_v54 }
 0x13d   :  { %1438 = vmatpush.bf16.msrb.mxu1 %v2646_v2  ;;  %1464 = vmatpush.bf16.msrb.mxu3 %v2650_v6  ;;  %v2789_v2 = vld [vmem:[#allocation2 + $0x5a0] sm:$0xf]  ;;  %v2791_v6 = vld [vmem:[#allocation2 + $0x5a8] sm:$0xf0] }
 0x13e   :  { %v2790_v4 = vor.u32 %v3152_v3, %v2789_v2  ;;  %v2794_v7 = vor.u32 %v3151_v5, %v2791_v6  ;;  %v3176_v5 = vld [vmem:[%s3454_s3 + $0x68] sm:$0xff]  ;;  %v3167_v6 = vld [vmem:[%s3454_s3 + $0x20] sm:$0xff] }
 0x13f   :  { %1640 = vmatpush.bf16.msra.mxu0 %v2758_v61  ;;  %1666 = vmatpush.bf16.msra.mxu2 %v2762_v1  ;;  %v3134_v61 = vld [vmem:[#allocation2 + $0x514] sm:$0xf0]  ;;  %v2722_v1 = vor.u32 %v3133_v62, %v2719_v0 }
 0x140   :  { %v2718_v63 = vor.u32 %v3134_v61, %v2717_v60 }
 0x141   :  { %1652 = vmatpush.bf16.msra.mxu1 %v2830_v10  ;;  %1678 = vmatpush.bf16.msra.mxu3 %v2834_v11  ;;  %v3131_v10 = vld [vmem:[#allocation2 + $0x504] sm:$0xf]  ;;  %v2710_v11 = vor.u32 %v3132_v9, %v2709_v8  ;;  %v3166_v8 = vld [vmem:[%s3454_s3 + $0x18] sm:$0xff] }
 0x142   :  { %v2714_v13 = vor.u32 %v3131_v10, %v2711_v12  ;;  %v3174_v9 = vld [vmem:[%s3454_s3 + $0x58] sm:$0xff]  ;;  %v3165_v12 = vld [vmem:[%s3454_s3 + $0x10] sm:$0xff] }
 0x143   :  { %1641 = vmatpush.bf16.msra.mxu0 %v2750_v15  ;;  %1667 = vmatpush.bf16.msra.mxu2 %v2754_v17  ;;  %v3150_v15 = vld [vmem:[#allocation2 + $0x594] sm:$0xf0] }
 0x144   :  { %v2782_v17 = vor.u32 %v3150_v15, %v2781_v14  ;;  %v3186_v10 = vld [vmem:[%s3454_s3 + $0xb8] sm:$0xff]  ;;  %v3185_v14 = vld [vmem:[%s3454_s3 + $0xb0] sm:$0xff] }
 0x145   :  { %1653 = vmatpush.bf16.msra.mxu1 %v2822_v20  ;;  %1679 = vmatpush.bf16.msra.mxu3 %v2826_v23  ;;  %v742_v20 = vld [vmem:[%s3455_s4 + $0x4] sm:$0x3]  ;;  %v3193_v15 = vld [vmem:[%s3454_s3 + $0xf0] sm:$0xff] }
 0x146   :  { %v3147_v23 = vld [vmem:[#allocation2 + $0x584] sm:$0xf]  ;;  %v744_v28 = vperm.slane %v742_v20, 0 }
 0x147   :  { %1642 = vmatpush.bf16.msra.mxu0 %v2742_v27  ;;  %1668 = vmatpush.bf16.msra.mxu2 %v2746_v29  ;;  %v2778_v27 = vor.u32 %v3147_v23, %v2775_v25  ;;  %v3191_v23 = vld [vmem:[%s3454_s3 + $0xe0] sm:$0xff]  ;;  %v3190_v25 = vld [vmem:[%s3454_s3 + $0xd8] sm:$0xff] }
 0x149   :  { %1654 = vmatpush.bf16.msra.mxu1 %v2814_v33  ;;  %1680 = vmatpush.bf16.msra.mxu3 %v2818_v35  ;;  %v745_v33 = vperm.slane %v742_v20, 1  ;;  %v3163_v20 = vld [vmem:[%s3454_s3] sm:$0xff] }
 0x14b   :  { %1643 = vmatpush.bf16.msra.mxu0 %v2734_v39  ;;  %1669 = vmatpush.bf16.msra.mxu2 %v2738_v41 }
 0x14d   :  { %1655 = vmatpush.bf16.msra.mxu1 %v2806_v45  ;;  %1681 = vmatpush.bf16.msra.mxu3 %v2810_v47  ;;  %v3178_v47 = vld [vmem:[%s3454_s3 + $0x78] sm:$0xff] }
 0x14f   :  { %1644 = vmatpush.bf16.msra.mxu0 %v2726_v50  ;;  %1670 = vmatpush.bf16.msra.mxu2 %v2730_v53 }
 0x151   :  { %1656 = vmatpush.bf16.msra.mxu1 %v2798_v57  ;;  %1682 = vmatpush.bf16.msra.mxu3 %v2802_v59 }
 0x153   :  { %1645 = vmatpush.bf16.msra.mxu0 %v2718_v63  ;;  %1671 = vmatpush.bf16.msra.mxu2 %v2722_v1 }
 0x155   :  { %1657 = vmatpush.bf16.msra.mxu1 %v2790_v4  ;;  %1683 = vmatpush.bf16.msra.mxu3 %v2794_v7  ;;  %v3168_v4 = vld [vmem:[%s3454_s3 + $0x28] sm:$0xff]  ;;  %v3175_v7 = vld [vmem:[%s3454_s3 + $0x60] sm:$0xff] }
 0x157   :  { %1646 = vmatpush.bf16.msra.mxu0 %v2710_v11  ;;  %1672 = vmatpush.bf16.msra.mxu2 %v2714_v13  ;;  %v3194_v11 = vld [vmem:[%s3454_s3 + $0xf8] sm:$0xff]  ;;  %v3173_v13 = vld [vmem:[%s3454_s3 + $0x50] sm:$0xff] }
 0x159   :  { %1658 = vmatpush.bf16.msra.mxu1 %v2782_v17  ;;  %1684 = vmatpush.bf16.msra.mxu3 %v2786_v19  ;;  %v3172_v17 = vld [vmem:[%s3454_s3 + $0x48] sm:$0xff] }
 0x15a   :  { %v3192_v19 = vld [vmem:[%s3454_s3 + $0xe8] sm:$0xff] }
 0x15d   :  { %1659 = vmatpush.bf16.msra.mxu1 %v2774_v24  ;;  %1685 = vmatpush.bf16.msra.mxu3 %v2778_v27  ;;  %v3182_v24 = vld [vmem:[%s3454_s3 + $0x98] sm:$0xff]  ;;  %v3189_v27 = vld [vmem:[%s3454_s3 + $0xd0] sm:$0xff] }
 0x197   :  { %v917_v26 = vpop.f32.mrf.mxu0 }
 0x198   :  { %v918_v29 = vadd.f32 %v917_v26, %v744_v28  ;;  %v3181_v26 = vld [vmem:[%s3454_s3 + $0x90] sm:$0xff]  ;;  %v3180_v28 = vld [vmem:[%s3454_s3 + $0x88] sm:$0xff] }
 0x19d   :  { %v930_v30 = vpop.f32.mrf.mxu1  ;;  %v943_v31 = vpop.f32.mrf.mxu2 }
 0x19e   :  { %v931_v32 = vadd.f32 %v930_v30, %v918_v29  ;;  %v944_v38 = vadd.f32 %v943_v31, %v745_v33  ;;  %v3188_v29 = vld [vmem:[%s3454_s3 + $0xc8] sm:$0xff]  ;;  %v1252_v31 = vld [vmem:[%s3455_s4 + $0x6] sm:$0x3] }
 0x19f   :  { %v919_v34 = vpop.f32.mrf.mxu0  ;;  %v3187_v33 = vld [vmem:[%s3454_s3 + $0xc0] sm:$0xff] }
 0x1a0   :  { %v960_v35 = vmax.f32 %v931_v32, 0.0  ;;  %v3179_v32 = vld [vmem:[%s3454_s3 + $0x80] sm:$0xff]  ;;  %v1254_v34 = vperm.slane %v1252_v31, 0 }
 0x1a2   :  { %v962_v37 = vpack.c.bf16 %v960_v35, %v960_v35 }
 0x1a3   :  { %v956_v39 = vpop.f32.mrf.mxu3 }
 0x1a4   :  { %v957_v40 = vadd.f32 %v956_v39, %v944_v38  ;;  %1426 = vmatmul.bf16.vlgmr.msrb.gmra.mxu0 %v962_v37  ;;  %1452 = vmatmul.bf16.vlgmr.msrb.gmra.mxu2 %v962_v37  ;;  %v1255_v37 = vperm.slane %v1252_v31, 1 }
 0x1a5   :  { %v932_v41 = vpop.f32.mrf.mxu1  ;;  %v945_v42 = vpop.f32.mrf.mxu2  ;;  %1968 = vmatpush.bf16.msrb.mxu0 %v3170_v36  ;;  %1994 = vmatpush.bf16.msrb.mxu2 %v3186_v10 }
 0x1a6   :  { %v961_v45 = vmax.f32 %v957_v40, 0.0 }
 0x1a7   :  { %v1139_v46 = vpop.f32.mrf.mxu0 }
 0x1a8   :  { %v963_v48 = vpack.c.bf16 %v961_v45, %v961_v45  ;;  %v1140_v52 = vadd.f32 %v1139_v46, %v966_v49 }
 0x1a9   :  { %1969 = vmatpush.bf16.msrb.mxu0 %v3169_v44  ;;  %1995 = vmatpush.bf16.msrb.mxu2 %v3185_v14 }
 0x1aa   :  { %1439 = vmatmul.bf16.vlgmr.msrb.gmra.mxu1 %v963_v48  ;;  %1465 = vmatmul.bf16.vlgmr.msrb.gmra.mxu3 %v963_v48 }
 0x1ab   :  { %v958_v50 = vpop.f32.mrf.mxu3  ;;  %1981 = vmatpush.bf16.msrb.mxu1 %v3178_v47  ;;  %2007 = vmatpush.bf16.msrb.mxu3 %v3194_v11 }
 0x1ac   :  { %v1473_v50 = vld [vmem:[%s3455_s4 + $0xe] sm:$0x3] }
 0x1ad   :  { %v1152_v53 = vpop.f32.mrf.mxu1  ;;  %v1165_v54 = vpop.f32.mrf.mxu2  ;;  %1970 = vmatpush.bf16.msrb.mxu0 %v3168_v4  ;;  %1996 = vmatpush.bf16.msrb.mxu2 %v3184_v18 }
 0x1ae   :  { %v1153_v55 = vadd.f32 %v1152_v53, %v1140_v52  ;;  %v1166_v60 = vadd.f32 %v1165_v54, %v967_v56  ;;  %v1475_v56 = vperm.slane %v1473_v50, 0 }
 0x1af   :  { %v1141_v57 = vpop.f32.mrf.mxu0  ;;  %1982 = vmatpush.bf16.msrb.mxu1 %v3177_v51  ;;  %2008 = vmatpush.bf16.msrb.mxu3 %v3193_v15 }
 0x1b0   :  { %v1182_v58 = vmax.f32 %v1153_v55, 0.0 }
 0x1b1   :  { %1971 = vmatpush.bf16.msrb.mxu0 %v3167_v6  ;;  %1997 = vmatpush.bf16.msrb.mxu2 %v3183_v22 }
 0x1b2   :  { %v1184_v59 = vpack.c.bf16 %v1182_v58, %v1182_v58 }
 0x1b3   :  { %v1178_v61 = vpop.f32.mrf.mxu3  ;;  %1983 = vmatpush.bf16.msrb.mxu1 %v3176_v5  ;;  %2009 = vmatpush.bf16.msrb.mxu3 %v3192_v19 }
 0x1b4   :  { %v1179_v62 = vadd.f32 %v1178_v61, %v1166_v60  ;;  %1647 = vmatmul.bf16.vlgmr.msra.gmra.mxu0 %v1184_v59  ;;  %1673 = vmatmul.bf16.vlgmr.msra.gmra.mxu2 %v1184_v59  ;;  %v1476_v59 = vperm.slane %v1473_v50, 1 }
 0x1b5   :  { %v1154_v63 = vpop.f32.mrf.mxu1  ;;  %v1167_v0 = vpop.f32.mrf.mxu2  ;;  %1972 = vmatpush.bf16.msrb.mxu0 %v3166_v8  ;;  %1998 = vmatpush.bf16.msrb.mxu2 %v3182_v24 }
 0x1b6   :  { %v1183_v1 = vmax.f32 %v1179_v62, 0.0 }
 0x1b7   :  { %1984 = vmatpush.bf16.msrb.mxu1 %v3175_v7  ;;  %2010 = vmatpush.bf16.msrb.mxu3 %v3191_v23 }
 0x1b8   :  { %v1185_v2 = vpack.c.bf16 %v1183_v1, %v1183_v1 }
 0x1b9   :  { %1973 = vmatpush.bf16.msrb.mxu0 %v3165_v12  ;;  %1999 = vmatpush.bf16.msrb.mxu2 %v3181_v26 }
 0x1ba   :  { %1660 = vmatmul.bf16.vlgmr.msra.gmra.mxu1 %v1185_v2  ;;  %1686 = vmatmul.bf16.vlgmr.msra.gmra.mxu3 %v1185_v2 }
 0x1bb   :  { %v1180_v3 = vpop.f32.mrf.mxu3  ;;  %1985 = vmatpush.bf16.msrb.mxu1 %v3174_v9  ;;  %2011 = vmatpush.bf16.msrb.mxu3 %v3190_v25 }
 0x1bd   :  { %1974 = vmatpush.bf16.msrb.mxu0 %v3164_v16  ;;  %2000 = vmatpush.bf16.msrb.mxu2 %v3180_v28  ;;  %v3198_v16 = vld [vmem:[%s3456_s5] ss:$0 sm:$0xff] }
 0x1bf   :  { %1986 = vmatpush.bf16.msrb.mxu1 %v3173_v13  ;;  %2012 = vmatpush.bf16.msrb.mxu3 %v3189_v27 }
 0x1c1   :  { %1975 = vmatpush.bf16.msrb.mxu0 %v3163_v20  ;;  %2001 = vmatpush.bf16.msrb.mxu2 %v3179_v32 }
 0x1c3   :  { %1987 = vmatpush.bf16.msrb.mxu1 %v3172_v17  ;;  %2013 = vmatpush.bf16.msrb.mxu3 %v3188_v29 }
 0x1c7   :  { %1988 = vmatpush.bf16.msrb.mxu1 %v3171_v21  ;;  %2014 = vmatpush.bf16.msrb.mxu3 %v3187_v33 }
 0x221   :  { %v1427_v30 = vpop.f32.mrf.mxu0 }
 0x222   :  { %v1428_v39 = vadd.f32 %v1427_v30, %v1254_v34 }
 0x227   :  { %v1440_v35 = vpop.f32.mrf.mxu1  ;;  %v1453_v36 = vpop.f32.mrf.mxu2 }
 0x228   :  { %v1441_v40 = vadd.f32 %v1440_v35, %v1428_v39  ;;  %v1454_v41 = vadd.f32 %v1453_v36, %v1255_v37 }
 0x229   :  { %v1429_v38 = vpop.f32.mrf.mxu0 }
 0x22a   :  { %v1470_v46 = vmax.f32 %v1441_v40, 0.0 }
 0x22d   :  { %v1466_v42 = vpop.f32.mrf.mxu3 }
 0x22e   :  { %v1467_v43 = vadd.f32 %v1466_v42, %v1454_v41 }
 0x22f   :  { %v1442_v44 = vpop.f32.mrf.mxu1  ;;  %v1455_v45 = vpop.f32.mrf.mxu2 }
 0x230   :  { %v1471_v47 = vmax.f32 %v1467_v43, 0.0 }
 0x231   :  { %v1648_v48 = vpop.f32.mrf.mxu0 }
 0x232   :  { %v1472_v49 = vpack.c.bf16 %v1471_v47, %v1470_v46  ;;  %v1649_v61 = vadd.f32 %v1648_v48, %v1475_v56 }
 0x234   :  { %v1695_v51 = vunpack.c.l.b16 %v1472_v49  ;;  %v1696_v52 = vunpack.c.h.b16 %v1472_v49 }
 0x235   :  { %v1468_v53 = vpop.f32.mrf.mxu3 }
 0x236   :  { %v1697_v54 = vpack.c.b16 %v1695_v51, %v1695_v51  ;;  %v1698_v55 = vpack.c.b16 %v1696_v52, %v1696_v52 }
 0x237   :  { %v1661_v57 = vpop.f32.mrf.mxu1  ;;  %v1674_v58 = vpop.f32.mrf.mxu2 }
 0x238   :  { %1976 = vmatmul.bf16.vlgmr.msrb.gmra.mxu0 %v1697_v54  ;;  %1989 = vmatmul.bf16.vlgmr.msrb.gmra.mxu1 %v1698_v55  ;;  %v1662_v62 = vadd.f32 %v1661_v57, %v1649_v61  ;;  %v1675_v63 = vadd.f32 %v1674_v58, %v1476_v59 }
 0x239   :  { %v1650_v60 = vpop.f32.mrf.mxu0 }
 0x23a   :  { %v1691_v4 = vmax.f32 %v1662_v62, 0.0 }
 0x23d   :  { %v1687_v0 = vpop.f32.mrf.mxu3 }
 0x23e   :  { %v1688_v1 = vadd.f32 %v1687_v0, %v1675_v63 }
 0x23f   :  { %v1663_v2 = vpop.f32.mrf.mxu1  ;;  %v1676_v3 = vpop.f32.mrf.mxu2 }
 0x240   :  { %v1692_v5 = vmax.f32 %v1688_v1, 0.0 }
 0x242   :  { %v1693_v6 = vpack.c.bf16 %v1692_v5, %v1691_v4 }
 0x244   :  { %v1702_v7 = vunpack.c.l.b16 %v1693_v6  ;;  %v1703_v8 = vunpack.c.h.b16 %v1693_v6 }
 0x245   :  { %v1689_v9 = vpop.f32.mrf.mxu3 }
 0x246   :  { %v1704_v10 = vpack.c.b16 %v1702_v7, %v1702_v7  ;;  %v1705_v11 = vpack.c.b16 %v1703_v8, %v1703_v8 }
 0x248   :  { %2002 = vmatmul.bf16.vlgmr.msrb.gmra.mxu2 %v1704_v10  ;;  %2015 = vmatmul.bf16.vlgmr.msrb.gmra.mxu3 %v1705_v11 }
 0x2b5   :  { %v1977_v12 = vpop.f32.mrf.mxu0  ;;  %v1990_v13 = vpop.f32.mrf.mxu1 }
 0x2b6   :  { %v1978_v17 = vadd.f32 %v3198_v16, %v1977_v12 }
 0x2b8   :  { %v1991_v18 = vadd.f32 %v1990_v13, %v1978_v17 }
 0x2bd   :  { %v1979_v14 = vpop.f32.mrf.mxu0  ;;  %v1992_v15 = vpop.f32.mrf.mxu1 }
 0x2cb   :  { %v2003_v19 = vpop.f32.mrf.mxu2  ;;  %v2016_v20 = vpop.f32.mrf.mxu3 }
 0x2cc   :  { %v2004_v21 = vadd.f32 %v2003_v19, %v1991_v18 }
 0x2ce   :  { %v2017_v22 = vadd.f32 %v2016_v20, %v2004_v21 }
 0x2d0   :  { %2021 = vst.msk [vmem:[%s3457_s6] sm:$0xff] %vm2020_vm1, %v2017_v22 }
 0x2d3   :  { %v2005_v23 = vpop.f32.mrf.mxu2  ;;  %v2018_v24 = vpop.f32.mrf.mxu3 }
 0x2d4   :  { %2026 = vsyncpa [#allocation3], 1 }

</bundles_post_ra>
